<compile_context>
chip_gen: v7x
topology: tpu7x:2x2x1
jax: 0.10.0
libtpu: 0.0.40
codegen_flags: <defaults>
</compile_context>

<pallas_src>
import math

import jax
import jax.numpy as jnp
from jax.experimental import pallas as pl
from jax.experimental.pallas import tpu as pltpu


def _round_up(n: int, m: int) -> int:
    return ((n + m - 1) // m) * m


def _cdiv(a: int, b: int) -> int:
    return -(-a // b)


def _pack_factor(d: int) -> int:
    """Smallest row-group size so that (pack * d) is a multiple of 128 lanes."""
    return 128 // math.gcd(d, 128)


def _pick_vmem_limit() -> int:
    """Scoped-VMEM budget: big enough for large double-buffered tiles (v5e's
    scoped default is only 16 MiB) but capped below physical capacity
    (64 MiB per TensorCore on v7x)."""
    limit = 64 * 1024 * 1024
    try:
        cap = getattr(pltpu.get_tpu_info(), "vmem_capacity_bytes", None)
        if cap:
            limit = min(limit, (int(cap) * 3) // 4)
    except Exception:
        pass
    return limit


def _mlp_block(x, w1, b1, w2, b2, out_dtype):
    """Linear -> ReLU -> Linear with f32 MXU accumulation."""
    h = jnp.dot(x, w1, preferred_element_type=jnp.float32)
    h = jnp.maximum(h + b1, 0.0)
    # Intentional: hidden down-cast to the weight dtype (bf16 path stays bf16
    # on the MXU); f32 path is numerically unchanged. Accumulate in f32.
    y = jnp.dot(h.astype(w2.dtype), w2, preferred_element_type=jnp.float32)
    return (y + b2).astype(out_dtype)


def _packed_kernel(xp_ref, w1_ref, b1_ref, w2_ref, b2_ref, op_ref):
    """Lane-dense kernel: xp_ref is (tb/px, px*d_in), op_ref is (tb/po, po*d_out)."""
    d_in = w1_ref.shape[0]
    tb = (xp_ref.shape[0] * xp_ref.shape[1]) // d_in
    x = xp_ref[...].reshape(tb, d_in)                 # unpack slab -> (tb, d_in)
    y = _mlp_block(x, w1_ref[...], b1_ref[...], w2_ref[...], b2_ref[...],
                   op_ref.dtype)
    op_ref[...] = y.reshape(op_ref.shape)             # pack -> lane-dense store


def _flat_kernel(x_ref, w1_ref, b1_ref, w2_ref, b2_ref, o_ref):
    """Fallback kernel (previous, un-packed layout); known-good lowering."""
    o_ref[...] = _mlp_block(x_ref[...], w1_ref[...], b1_ref[...], w2_ref[...],
                            b2_ref[...], o_ref.dtype)


def decoder_ref(x, w1, b1, w2, b2):
    """Pure-JAX reference."""
    b1 = jnp.reshape(b1, (1, -1))
    b2 = jnp.reshape(b2, (1, -1))
    return jnp.maximum(x @ w1 + b1, 0.0) @ w2 + b2


def my_linear_decoder(x, w1, b1, w2, b2, *, tile_b=8192, min_pallas_batch=512):
    """Fused Linear(10->20) -> ReLU -> Linear(20->40) on TPU via Pallas.

    x:  (B, 10)   -- f32 or bf16
    w1: (10, 20), b1: (1, 20) or (20,)
    w2: (20, 40), b2: (1, 40) or (40,)
    returns (B, 40) in x.dtype.
    """
    B, d_in = x.shape
    d_hid = w1.shape[1]
    d_out = w2.shape[1]
    dtype = x.dtype

    # --- Small-batch dispatch: the pallas_call launch + padding costs more
    # than the whole fused-XLA MLP for tiny (deployment-size) batches.
    if B < min_pallas_batch:
        h = jnp.dot(x, w1.astype(dtype), preferred_element_type=jnp.float32)
        h = jnp.maximum(h + jnp.reshape(b1, (1, d_hid)).astype(jnp.float32), 0.0)
        y = jnp.dot(h.astype(dtype), w2.astype(dtype),
                    preferred_element_type=jnp.float32)
        y = y + jnp.reshape(b2, (1, d_out)).astype(jnp.float32)
        return y.astype(dtype)

    # --- Pad only the tiny, VMEM-resident weights to a 128-lane hidden width.
    d_hid_p = _round_up(d_hid, 128)
    w1p = jnp.zeros((d_in, d_hid_p), dtype).at[:, :d_hid].set(w1.astype(dtype))
    b1p = jnp.zeros((1, d_hid_p), jnp.float32).at[:, :d_hid].set(
        jnp.reshape(b1, (1, d_hid)).astype(jnp.float32))
    w2p = jnp.zeros((d_hid_p, d_out), dtype).at[:d_hid, :].set(w2.astype(dtype))
    b2p = jnp.reshape(b2, (1, d_out)).astype(jnp.float32)

    # --- Lane-dense packing factors (64 rows of 10 = 640 lanes; 16 rows of 40
    # = 640 lanes) and the batch-tile alignment that keeps packed sublane
    # counts multiples of 8.
    pack_x = _pack_factor(d_in)     # 64 for d_in=10
    pack_o = _pack_factor(d_out)    # 16 for d_out=40
    align = 8 * math.lcm(pack_x, pack_o)  # 512

    # --- Batch tiling: large tiles to amortize per-grid-step overhead; nudge
    # the tile count to an even number so a v7x core-parallel split balances.
    tb = max(align, min(_round_up(tile_b, align), _round_up(B, align)))
    nb = _cdiv(B, tb)
    if nb > 1 and nb % 2 == 1:
        tb2 = _round_up(_cdiv(B, nb + 1), align)
        if _cdiv(B, tb2) % 2 == 0:
            tb, nb = tb2, _cdiv(B, tb2)
    b_pad = nb * tb
    if b_pad != B:
        x = jnp.pad(x, ((0, b_pad - B), (0, 0)))   # zero tail, sliced off below

    # Free (row-major contiguous) reshape to the 640-lane input slab.
    x_packed = x.reshape(b_pad // pack_x, pack_x * d_in)

    itemsize = jnp.dtype(dtype).itemsize
    cost = pl.CostEstimate(
        flops=2 * B * (d_in * d_hid + d_hid * d_out),
        transcendentals=0,
        bytes_accessed=(B * (d_in + d_out) * itemsize
                        + (w1p.size + w2p.size) * itemsize
                        + (b1p.size + b2p.size) * 4),
    )
    vmem_limit = _pick_vmem_limit()

    w_specs = [
        pl.BlockSpec((d_in, d_hid_p), lambda i: (0, 0)),    # w1: resident
        pl.BlockSpec((1, d_hid_p), lambda i: (0, 0)),       # b1: resident
        pl.BlockSpec((d_hid_p, d_out), lambda i: (0, 0)),   # w2: resident
        pl.BlockSpec((1, d_out), lambda i: (0, 0)),         # b2: resident
    ]

    def run(kernel, x_arg, x_spec, out_spec, out_shape, semantics):
        return pl.pallas_call(
            kernel,
            out_shape=out_shape,
            grid_spec=pltpu.PrefetchScalarGridSpec(
                num_scalar_prefetch=0,
                grid=(nb,),
                in_specs=[x_spec] + w_specs,
                out_specs=out_spec),
            compiler_params=pltpu.CompilerParams(
                dimension_semantics=(semantics,),
                vmem_limit_bytes=vmem_limit),
            cost_estimate=cost,
        )(x_arg, w1p, b1p, w2p, b2p)

    packed_x_spec = pl.BlockSpec((tb // pack_x, pack_x * d_in), lambda i: (i, 0))
    packed_o_spec = pl.BlockSpec((tb // pack_o, pack_o * d_out), lambda i: (i, 0))
    packed_o_shape = jax.ShapeDtypeStruct((b_pad // pack_o, pack_o * d_out), dtype)

    # CORE_PARALLEL is what actually shards the batch grid across v7x's two
    # TensorCores; fall back gracefully where the runtime rejects it.
    core_par = getattr(pltpu, "CORE_PARALLEL", "parallel")
    for semantics in (core_par, "parallel"):
        try:
            out_packed = run(_packed_kernel, x_packed, packed_x_spec,
                             packed_o_spec, packed_o_shape, semantics)
            return out_packed.reshape(b_pad, d_out)[:B]
        except Exception:
            continue

    # Last-resort fallback: previous (lane-sparse) layout, known-good lowering.
    out = run(_flat_kernel, x,
              pl.BlockSpec((tb, d_in), lambda i: (i, 0)),
              pl.BlockSpec((tb, d_out), lambda i: (i, 0)),
              jax.ShapeDtypeStruct((b_pad, d_out), dtype), "parallel")
    return out[:B]


def init_params(key, inputdim=10):
    """Deterministic init mimicking torch.nn.Linear's U(-1/sqrt(fan_in), ...)."""
    k1, k2, k3, k4 = jax.random.split(key, 4)
    d0, d1, d2 = inputdim, inputdim * 2, inputdim * 4  # 10 -> 20 -> 40
    lim1 = 1.0 / jnp.sqrt(d0)
    lim2 = 1.0 / jnp.sqrt(d1)
    w1 = jax.random.uniform(k1, (d0, d1), jnp.float32, -lim1, lim1)
    b1 = jax.random.uniform(k2, (1, d1), jnp.float32, -lim1, lim1)
    w2 = jax.random.uniform(k3, (d1, d2), jnp.float32, -lim2, lim2)
    b2 = jax.random.uniform(k4, (1, d2), jnp.float32, -lim2, lim2)
    return w1, b1, w2, b2


if __name__ == "__main__":
    key = jax.random.PRNGKey(0)
    kx, kp = jax.random.split(key)

    inputdim = 10
    w1, b1, w2, b2 = init_params(kp, inputdim)

    # --- Small-shape check (B=2, f32): force the Pallas path so the kernel is
    # exercised; matches the PyTorch module exactly.
    B = 2
    x = jax.random.normal(kx, (B, inputdim), jnp.float32)
    out = jax.block_until_ready(
        my_linear_decoder(x, w1, b1, w2, b2, min_pallas_batch=0))
    ref = decoder_ref(x, w1, b1, w2, b2)
    assert out.shape == (B, inputdim * 4)
    assert out.dtype == jnp.float32
    assert jnp.allclose(out, ref, atol=1e-5, rtol=1e-5)

    # --- Small-batch dispatch (fused-XLA path) gives the same answer.
    out_d = jax.block_until_ready(my_linear_decoder(x, w1, b1, w2, b2))
    assert jnp.allclose(out_d, ref, atol=1e-5, rtol=1e-5)

    # --- Larger, non-tile-multiple batch exercising the multi-step grid, the
    # lane-dense packed pipeline and the bf16 I/O path.
    B2 = 2050
    x2 = jax.random.normal(jax.random.PRNGKey(1), (B2, inputdim), jnp.float32)
    x2_bf = x2.astype(jnp.bfloat16)
    w1_bf = w1.astype(jnp.bfloat16)
    w2_bf = w2.astype(jnp.bfloat16)
    out2 = jax.block_until_ready(
        my_linear_decoder(x2_bf, w1_bf, b1, w2_bf, b2, tile_b=1024))
    ref2 = decoder_ref(x2_bf.astype(jnp.float32),
                       w1_bf.astype(jnp.float32), b1,
                       w2_bf.astype(jnp.float32), b2)
    assert out2.shape == (B2, inputdim * 4)
    assert out2.dtype == jnp.bfloat16
    assert jnp.allclose(out2.astype(jnp.float32), ref2, atol=5e-2, rtol=5e-2)

    # --- Default (large-tile) f32 path.
    out3 = jax.block_until_ready(my_linear_decoder(x2, w1, b1, w2, b2))
    ref3 = decoder_ref(x2, w1, b1, w2, b2)
    assert jnp.allclose(out3, ref3, atol=1e-5, rtol=1e-5)

    print("KERNEL_OK")
</pallas_src>

<mosaic_0001>
module attributes {stable_mosaic.version = 11 : i64} {
  func.func @_packed_kernel(%arg0: i32, %arg1: memref<8x640xf32, #tpu.memory_space<vmem>>, %arg2: memref<10x128xf32, #tpu.memory_space<vmem>>, %arg3: memref<1x128xf32, #tpu.memory_space<vmem>>, %arg4: memref<128x40xf32, #tpu.memory_space<vmem>>, %arg5: memref<1x40xf32, #tpu.memory_space<vmem>>, %arg6: memref<32x640xf32, #tpu.memory_space<vmem>>) attributes {dimension_semantics = [#tpu.dimension_semantics<core_parallel>], iteration_bounds = array<i64: 1>, scalar_prefetch = 0 : i64, scratch_operands = 0 : i64, tpu.core_type = #tpu.core_type<tc>, window_params = [{transform_indices = @transform_0, window_bounds = array<i64: 8, 640>}, {pipeline_mode = #tpu.pipeline_mode<synchronous>, transform_indices = @transform_1, window_bounds = array<i64: 10, 128>}, {pipeline_mode = #tpu.pipeline_mode<synchronous>, transform_indices = @transform_2, window_bounds = array<i64: 1, 128>}, {pipeline_mode = #tpu.pipeline_mode<synchronous>, transform_indices = @transform_3, window_bounds = array<i64: 128, 40>}, {pipeline_mode = #tpu.pipeline_mode<synchronous>, transform_indices = @transform_4, window_bounds = array<i64: 1, 40>}, {transform_indices = @transform_5, window_bounds = array<i64: 32, 640>}]} {
    %c0 = arith.constant 0 : index
    %c0_0 = arith.constant 0 : index
    %0 = vector.load %arg1[%c0, %c0_0] : memref<8x640xf32, #tpu.memory_space<vmem>>, vector<8x640xf32>
    %1 = vector.shape_cast %0 : vector<8x640xf32> to vector<512x10xf32>
    %c0_1 = arith.constant 0 : index
    %c0_2 = arith.constant 0 : index
    %2 = vector.load %arg2[%c0_1, %c0_2] : memref<10x128xf32, #tpu.memory_space<vmem>>, vector<10x128xf32>
    %c0_3 = arith.constant 0 : index
    %c0_4 = arith.constant 0 : index
    %3 = vector.load %arg3[%c0_3, %c0_4] : memref<1x128xf32, #tpu.memory_space<vmem>>, vector<1x128xf32>
    %c0_5 = arith.constant 0 : index
    %c0_6 = arith.constant 0 : index
    %4 = vector.load %arg4[%c0_5, %c0_6] : memref<128x40xf32, #tpu.memory_space<vmem>>, vector<128x40xf32>
    %c0_7 = arith.constant 0 : index
    %c0_8 = arith.constant 0 : index
    %5 = vector.load %arg5[%c0_7, %c0_8] : memref<1x40xf32, #tpu.memory_space<vmem>>, vector<1x40xf32>
    %cst = arith.constant dense<0.000000e+00> : vector<512x128xf32>
    %6 = tpu.matmul %1, %2, %cst {dimension_numbers = #tpu.dot_dimension_numbers<[1], [0], [0], [1], [0, 0, 1, 1], [], []>} : vector<512x10xf32>, vector<10x128xf32>, vector<512x128xf32> -> vector<512x128xf32>
    %7 = vector.broadcast %3 : vector<1x128xf32> to vector<512x128xf32>
    %8 = arith.addf %6, %7 : vector<512x128xf32>
    %cst_9 = arith.constant 0.000000e+00 : f32
    %9 = vector.broadcast %cst_9 : f32 to vector<512x128xf32>
    %10 = arith.maximumf %8, %9 : vector<512x128xf32>
    %cst_10 = arith.constant dense<0.000000e+00> : vector<512x40xf32>
    %11 = tpu.matmul %10, %4, %cst_10 {dimension_numbers = #tpu.dot_dimension_numbers<[1], [0], [0], [1], [0, 0, 1, 1], [], []>} : vector<512x128xf32>, vector<128x40xf32>, vector<512x40xf32> -> vector<512x40xf32>
    %12 = vector.broadcast %5 : vector<1x40xf32> to vector<512x40xf32>
    %13 = arith.addf %11, %12 : vector<512x40xf32>
    %14 = vector.shape_cast %13 : vector<512x40xf32> to vector<32x640xf32>
    %c0_11 = arith.constant 0 : index
    %c0_12 = arith.constant 0 : index
    %15 = vector.load %arg6[%c0_11, %c0_12] : memref<32x640xf32, #tpu.memory_space<vmem>>, vector<32x640xf32>
    tpu.vector_store %arg6[%c0_11, %c0_12], %14 {strides = array<i32>} : memref<32x640xf32, #tpu.memory_space<vmem>>, vector<32x640xf32>,
    return
  }
  func.func @transform_0(%arg0: i32) -> (i32, i32) {
    %c0_i32 = arith.constant 0 : i32
    %c0_i32_0 = arith.constant 0 : i32
    return %arg0, %c0_i32 : i32, i32
  }
  func.func @transform_1(%arg0: i32) -> (i32, i32) {
    %c0_i32 = arith.constant 0 : i32
    %c0_i32_0 = arith.constant 0 : i32
    %c0_i32_1 = arith.constant 0 : i32
    return %c0_i32, %c0_i32_0 : i32, i32
  }
  func.func @transform_2(%arg0: i32) -> (i32, i32) {
    %c0_i32 = arith.constant 0 : i32
    %c0_i32_0 = arith.constant 0 : i32
    %c0_i32_1 = arith.constant 0 : i32
    return %c0_i32, %c0_i32_0 : i32, i32
  }
  func.func @transform_3(%arg0: i32) -> (i32, i32) {
    %c0_i32 = arith.constant 0 : i32
    %c0_i32_0 = arith.constant 0 : i32
    %c0_i32_1 = arith.constant 0 : i32
    return %c0_i32, %c0_i32_0 : i32, i32
  }
  func.func @transform_4(%arg0: i32) -> (i32, i32) {
    %c0_i32 = arith.constant 0 : i32
    %c0_i32_0 = arith.constant 0 : i32
    %c0_i32_1 = arith.constant 0 : i32
    return %c0_i32, %c0_i32_0 : i32, i32
  }
  func.func @transform_5(%arg0: i32) -> (i32, i32) {
    %c0_i32 = arith.constant 0 : i32
    %c0_i32_0 = arith.constant 0 : i32
    return %arg0, %c0_i32 : i32, i32
  }
}

module attributes {stable_mosaic.version = 11 : i64} {
  func.func @_packed_kernel(%arg0: i32, %arg1: memref<8x640xf32, #tpu.memory_space<vmem>>, %arg2: memref<10x128xf32, #tpu.memory_space<vmem>>, %arg3: memref<1x128xf32, #tpu.memory_space<vmem>>, %arg4: memref<128x40xf32, #tpu.memory_space<vmem>>, %arg5: memref<1x40xf32, #tpu.memory_space<vmem>>, %arg6: memref<32x640xf32, #tpu.memory_space<vmem>>) attributes {dimension_semantics = [#tpu.dimension_semantics<parallel>], iteration_bounds = array<i64: 1>, scalar_prefetch = 0 : i64, scratch_operands = 0 : i64, tpu.core_type = #tpu.core_type<tc>, window_params = [{transform_indices = @transform_0, window_bounds = array<i64: 8, 640>}, {pipeline_mode = #tpu.pipeline_mode<synchronous>, transform_indices = @transform_1, window_bounds = array<i64: 10, 128>}, {pipeline_mode = #tpu.pipeline_mode<synchronous>, transform_indices = @transform_2, window_bounds = array<i64: 1, 128>}, {pipeline_mode = #tpu.pipeline_mode<synchronous>, transform_indices = @transform_3, window_bounds = array<i64: 128, 40>}, {pipeline_mode = #tpu.pipeline_mode<synchronous>, transform_indices = @transform_4, window_bounds = array<i64: 1, 40>}, {transform_indices = @transform_5, window_bounds = array<i64: 32, 640>}]} {
    %c0 = arith.constant 0 : index
    %c0_0 = arith.constant 0 : index
    %0 = vector.load %arg1[%c0, %c0_0] : memref<8x640xf32, #tpu.memory_space<vmem>>, vector<8x640xf32>
    %1 = vector.shape_cast %0 : vector<8x640xf32> to vector<512x10xf32>
    %c0_1 = arith.constant 0 : index
    %c0_2 = arith.constant 0 : index
    %2 = vector.load %arg2[%c0_1, %c0_2] : memref<10x128xf32, #tpu.memory_space<vmem>>, vector<10x128xf32>
    %c0_3 = arith.constant 0 : index
    %c0_4 = arith.constant 0 : index
    %3 = vector.load %arg3[%c0_3, %c0_4] : memref<1x128xf32, #tpu.memory_space<vmem>>, vector<1x128xf32>
    %c0_5 = arith.constant 0 : index
    %c0_6 = arith.constant 0 : index
    %4 = vector.load %arg4[%c0_5, %c0_6] : memref<128x40xf32, #tpu.memory_space<vmem>>, vector<128x40xf32>
    %c0_7 = arith.constant 0 : index
    %c0_8 = arith.constant 0 : index
    %5 = vector.load %arg5[%c0_7, %c0_8] : memref<1x40xf32, #tpu.memory_space<vmem>>, vector<1x40xf32>
    %cst = arith.constant dense<0.000000e+00> : vector<512x128xf32>
    %6 = tpu.matmul %1, %2, %cst {dimension_numbers = #tpu.dot_dimension_numbers<[1], [0], [0], [1], [0, 0, 1, 1], [], []>} : vector<512x10xf32>, vector<10x128xf32>, vector<512x128xf32> -> vector<512x128xf32>
    %7 = vector.broadcast %3 : vector<1x128xf32> to vector<512x128xf32>
    %8 = arith.addf %6, %7 : vector<512x128xf32>
    %cst_9 = arith.constant 0.000000e+00 : f32
    %9 = vector.broadcast %cst_9 : f32 to vector<512x128xf32>
    %10 = arith.maximumf %8, %9 : vector<512x128xf32>
    %cst_10 = arith.constant dense<0.000000e+00> : vector<512x40xf32>
    %11 = tpu.matmul %10, %4, %cst_10 {dimension_numbers = #tpu.dot_dimension_numbers<[1], [0], [0], [1], [0, 0, 1, 1], [], []>} : vector<512x128xf32>, vector<128x40xf32>, vector<512x40xf32> -> vector<512x40xf32>
    %12 = vector.broadcast %5 : vector<1x40xf32> to vector<512x40xf32>
    %13 = arith.addf %11, %12 : vector<512x40xf32>
    %14 = vector.shape_cast %13 : vector<512x40xf32> to vector<32x640xf32>
    %c0_11 = arith.constant 0 : index
    %c0_12 = arith.constant 0 : index
    %15 = vector.load %arg6[%c0_11, %c0_12] : memref<32x640xf32, #tpu.memory_space<vmem>>, vector<32x640xf32>
    tpu.vector_store %arg6[%c0_11, %c0_12], %14 {strides = array<i32>} : memref<32x640xf32, #tpu.memory_space<vmem>>, vector<32x640xf32>,
    return
  }
  func.func @transform_0(%arg0: i32) -> (i32, i32) {
    %c0_i32 = arith.constant 0 : i32
    %c0_i32_0 = arith.constant 0 : i32
    return %arg0, %c0_i32 : i32, i32
  }
  func.func @transform_1(%arg0: i32) -> (i32, i32) {
    %c0_i32 = arith.constant 0 : i32
    %c0_i32_0 = arith.constant 0 : i32
    %c0_i32_1 = arith.constant 0 : i32
    return %c0_i32, %c0_i32_0 : i32, i32
  }
  func.func @transform_2(%arg0: i32) -> (i32, i32) {
    %c0_i32 = arith.constant 0 : i32
    %c0_i32_0 = arith.constant 0 : i32
    %c0_i32_1 = arith.constant 0 : i32
    return %c0_i32, %c0_i32_0 : i32, i32
  }
  func.func @transform_3(%arg0: i32) -> (i32, i32) {
    %c0_i32 = arith.constant 0 : i32
    %c0_i32_0 = arith.constant 0 : i32
    %c0_i32_1 = arith.constant 0 : i32
    return %c0_i32, %c0_i32_0 : i32, i32
  }
  func.func @transform_4(%arg0: i32) -> (i32, i32) {
    %c0_i32 = arith.constant 0 : i32
    %c0_i32_0 = arith.constant 0 : i32
    %c0_i32_1 = arith.constant 0 : i32
    return %c0_i32, %c0_i32_0 : i32, i32
  }
  func.func @transform_5(%arg0: i32) -> (i32, i32) {
    %c0_i32 = arith.constant 0 : i32
    %c0_i32_0 = arith.constant 0 : i32
    return %arg0, %c0_i32 : i32, i32
  }
}

module attributes {stable_mosaic.version = 11 : i64} {
  func.func @_flat_kernel(%arg0: i32, %arg1: memref<512x10xf32, #tpu.memory_space<vmem>>, %arg2: memref<10x128xf32, #tpu.memory_space<vmem>>, %arg3: memref<1x128xf32, #tpu.memory_space<vmem>>, %arg4: memref<128x40xf32, #tpu.memory_space<vmem>>, %arg5: memref<1x40xf32, #tpu.memory_space<vmem>>, %arg6: memref<512x40xf32, #tpu.memory_space<vmem>>) attributes {dimension_semantics = [#tpu.dimension_semantics<parallel>], iteration_bounds = array<i64: 1>, scalar_prefetch = 0 : i64, scratch_operands = 0 : i64, tpu.core_type = #tpu.core_type<tc>, window_params = [{transform_indices = @transform_0, window_bounds = array<i64: 512, 10>}, {pipeline_mode = #tpu.pipeline_mode<synchronous>, transform_indices = @transform_1, window_bounds = array<i64: 10, 128>}, {pipeline_mode = #tpu.pipeline_mode<synchronous>, transform_indices = @transform_2, window_bounds = array<i64: 1, 128>}, {pipeline_mode = #tpu.pipeline_mode<synchronous>, transform_indices = @transform_3, window_bounds = array<i64: 128, 40>}, {pipeline_mode = #tpu.pipeline_mode<synchronous>, transform_indices = @transform_4, window_bounds = array<i64: 1, 40>}, {transform_indices = @transform_5, window_bounds = array<i64: 512, 40>}]} {
    %c0 = arith.constant 0 : index
    %c0_0 = arith.constant 0 : index
    %0 = vector.load %arg1[%c0, %c0_0] : memref<512x10xf32, #tpu.memory_space<vmem>>, vector<512x10xf32>
    %c0_1 = arith.constant 0 : index
    %c0_2 = arith.constant 0 : index
    %1 = vector.load %arg2[%c0_1, %c0_2] : memref<10x128xf32, #tpu.memory_space<vmem>>, vector<10x128xf32>
    %c0_3 = arith.constant 0 : index
    %c0_4 = arith.constant 0 : index
    %2 = vector.load %arg3[%c0_3, %c0_4] : memref<1x128xf32, #tpu.memory_space<vmem>>, vector<1x128xf32>
    %c0_5 = arith.constant 0 : index
    %c0_6 = arith.constant 0 : index
    %3 = vector.load %arg4[%c0_5, %c0_6] : memref<128x40xf32, #tpu.memory_space<vmem>>, vector<128x40xf32>
    %c0_7 = arith.constant 0 : index
    %c0_8 = arith.constant 0 : index
    %4 = vector.load %arg5[%c0_7, %c0_8] : memref<1x40xf32, #tpu.memory_space<vmem>>, vector<1x40xf32>
    %cst = arith.constant dense<0.000000e+00> : vector<512x128xf32>
    %5 = tpu.matmul %0, %1, %cst {dimension_numbers = #tpu.dot_dimension_numbers<[1], [0], [0], [1], [0, 0, 1, 1], [], []>} : vector<512x10xf32>, vector<10x128xf32>, vector<512x128xf32> -> vector<512x128xf32>
    %6 = vector.broadcast %2 : vector<1x128xf32> to vector<512x128xf32>
    %7 = arith.addf %5, %6 : vector<512x128xf32>
    %cst_9 = arith.constant 0.000000e+00 : f32
    %8 = vector.broadcast %cst_9 : f32 to vector<512x128xf32>
    %9 = arith.maximumf %7, %8 : vector<512x128xf32>
    %cst_10 = arith.constant dense<0.000000e+00> : vector<512x40xf32>
    %10 = tpu.matmul %9, %3, %cst_10 {dimension_numbers = #tpu.dot_dimension_numbers<[1], [0], [0], [1], [0, 0, 1, 1], [], []>} : vector<512x128xf32>, vector<128x40xf32>, vector<512x40xf32> -> vector<512x40xf32>
    %11 = vector.broadcast %4 : vector<1x40xf32> to vector<512x40xf32>
    %12 = arith.addf %10, %11 : vector<512x40xf32>
    %c0_11 = arith.constant 0 : index
    %c0_12 = arith.constant 0 : index
    %13 = vector.load %arg6[%c0_11, %c0_12] : memref<512x40xf32, #tpu.memory_space<vmem>>, vector<512x40xf32>
    tpu.vector_store %arg6[%c0_11, %c0_12], %12 {strides = array<i32>} : memref<512x40xf32, #tpu.memory_space<vmem>>, vector<512x40xf32>,
    return
  }
  func.func @transform_0(%arg0: i32) -> (i32, i32) {
    %c0_i32 = arith.constant 0 : i32
    %c0_i32_0 = arith.constant 0 : i32
    return %arg0, %c0_i32 : i32, i32
  }
  func.func @transform_1(%arg0: i32) -> (i32, i32) {
    %c0_i32 = arith.constant 0 : i32
    %c0_i32_0 = arith.constant 0 : i32
    %c0_i32_1 = arith.constant 0 : i32
    return %c0_i32, %c0_i32_0 : i32, i32
  }
  func.func @transform_2(%arg0: i32) -> (i32, i32) {
    %c0_i32 = arith.constant 0 : i32
    %c0_i32_0 = arith.constant 0 : i32
    %c0_i32_1 = arith.constant 0 : i32
    return %c0_i32, %c0_i32_0 : i32, i32
  }
  func.func @transform_3(%arg0: i32) -> (i32, i32) {
    %c0_i32 = arith.constant 0 : i32
    %c0_i32_0 = arith.constant 0 : i32
    %c0_i32_1 = arith.constant 0 : i32
    return %c0_i32, %c0_i32_0 : i32, i32
  }
  func.func @transform_4(%arg0: i32) -> (i32, i32) {
    %c0_i32 = arith.constant 0 : i32
    %c0_i32_0 = arith.constant 0 : i32
    %c0_i32_1 = arith.constant 0 : i32
    return %c0_i32, %c0_i32_0 : i32, i32
  }
  func.func @transform_5(%arg0: i32) -> (i32, i32) {
    %c0_i32 = arith.constant 0 : i32
    %c0_i32_0 = arith.constant 0 : i32
    return %arg0, %c0_i32 : i32, i32
  }
}

</mosaic_0001>

<bundles_post_ra>
// kernel: tpu_custom_call.1
= control target key start
LH: loop header
LB: loop body
LE: loop exit
PB: predicated region body
PF: predicated region fallthrough
CT: control target
= control target key end

     0   :  { %10 = vsyncpa [#allocation3], 0  ;;  %s2330_s0 = inlined_call_operand.hbm [shape: f32[512,10], index: 0, kind: input, shape index: {}]   ;;  %s2331_s1 = inlined_call_operand.hbm [shape: f32[10,128], index: 1, kind: input, shape index: {}]   ;;  %s2332_s2 = inlined_call_operand.hbm [shape: f32[1,128], index: 2, kind: input, shape index: {}]   ;;  %s2333_s3 = inlined_call_operand.hbm [shape: f32[128,40], index: 3, kind: input, shape index: {}]   ;;  %s2334_s4 = inlined_call_operand.hbm [shape: f32[1,40], index: 4, kind: input, shape index: {}]   ;;  %s2335_s5 = inlined_call_operand.hbm [shape: f32[512,40], index: 5, kind: output, shape index: {}]  }
   0x1   :  { %11 = vsyncpa [#allocation6], 0 }
   0x2   :  { %12 = vsyncpa [#allocation9], 0 }
   0x3   :  { %13 = vsyncpa [#allocation4], 0  ;;  %s1940_s18 = smov [#allocation5]   ;;  %s1941_s20 = smov [#allocation8]  }
   0x4   :  { %s31_s19 = sshll.u32 %s1940_s18, 4  ;;  %s53_s21 = sshll.u32 %s1941_s20, 4  ;;  %s32_s19 = int_to_ptr.vmem [resolvable:$true] %s31_s19  ;;  %s1979_s21 = int_to_ptr.vmem [resolvable:$true] %s53_s21 }
   0x5   :  { %s1800_s24 = scalar_lea.hbm %s2331_s1, 256 }
   0x6   :  { %p1801_p0 = scmp.ne.s32.totalorder %s2331_s1, %s1800_s24  ;;  %p1804_p1 = scmp.lt.u32.totalorder %s1800_s24, %s2331_s1 }
   0x8   :  { %p1806_p2 = pnand %p1804_p1, %p1801_p0 }
   0xa   :  { %1809 = shalt.err (!%p1806_p2)
}
   0xb   :  { %s1810_s29 = scalar_lea.vmem %s32_s19, 256  ;;  %p1815_p4 = scmp.lt.s32.totalorder %s32_s19, %s32_s19 }
   0xc   :  { %p1811_p3 = scmp.ne.s32.totalorder %s32_s19, %s1810_s29  ;;  %p1816_p5 = scmp.lt.s32.totalorder %s1810_s29, %s1810_s29 }
   0xe   :  { %p1817_p6 = por %p1816_p5, %p1815_p4 }
  0x10   :  { %p1818_p7 = pnand %p1817_p6, %p1811_p3 }
  0x12   :  { %1821 = shalt.err (!%p1818_p7)
}
  0x13   :  { %s1942_s30 = smov 128   ;;  %s1943_s6 = smov 8  }
  0x14   :  { %37 = dma.hbm_to_vmem [thread:$0]  %s2331_s1, 256, %s32_s19, [#allocation6], %s1942_s30, %s1942_s30, %s1943_s6  }
  0x15   :  { %s1822_s11 = scalar_lea.hbm %s2333_s3, 2048 }
  0x16   :  { %p1823_p8 = scmp.ne.s32.totalorder %s2333_s3, %s1822_s11  ;;  %p1826_p9 = scmp.lt.u32.totalorder %s1822_s11, %s2333_s3 }
  0x18   :  { %p1828_p10 = pnand %p1826_p9, %p1823_p8 }
  0x1a   :  { %1831 = shalt.err (!%p1828_p10)
}
  0x1b   :  { %s1832_s16 = scalar_lea.vmem %s1979_s21, 2048  ;;  %p1837_p12 = scmp.lt.s32.totalorder %s1979_s21, %s1979_s21 }
  0x1c   :  { %p1833_p11 = scmp.ne.s32.totalorder %s1979_s21, %s1832_s16  ;;  %p1838_p13 = scmp.lt.s32.totalorder %s1832_s16, %s1832_s16 }
  0x1e   :  { %p1839_p0 = por %p1838_p13, %p1837_p12 }
  0x20   :  { %p1840_p1 = pnand %p1839_p0, %p1833_p11 }
  0x22   :  { %1843 = shalt.err (!%p1840_p1)
}
  0x23   :  { %59 = dma.hbm_to_vmem [thread:$0]  %s2333_s3, 2048, %s1979_s21, [#allocation9], %s1942_s30, %s1942_s30, %s1943_s6  }
  0x24   :  { %s1944_s18 = smov [#allocation2]   ;;  %s1945_s20 = smov [#allocation7]  }
  0x25   :  { %s19_s19 = sshll.u32 %s1944_s18, 4  ;;  %s44_s22 = sshll.u32 %s1945_s20, 4  ;;  %s20_s19 = int_to_ptr.vmem [resolvable:$true] %s19_s19  ;;  %s45_s22 = int_to_ptr.vmem [resolvable:$true] %s44_s22 }
  0x26   :  { %s1844_s25 = scalar_lea.hbm %s2330_s0, 8192 }
  0x27   :  { %p1845_p2 = scmp.ne.s32.totalorder %s2330_s0, %s1844_s25  ;;  %p1848_p3 = scmp.lt.u32.totalorder %s1844_s25, %s2330_s0 }
  0x29   :  { %p1850_p4 = pnand %p1848_p3, %p1845_p2 }
  0x2b   :  { %1853 = shalt.err (!%p1850_p4)
}
  0x2c   :  { %s1854_s3 = scalar_lea.vmem %s20_s19, 8192  ;;  %p1859_p6 = scmp.lt.s32.totalorder %s20_s19, %s20_s19 }
  0x2d   :  { %p1855_p5 = scmp.ne.s32.totalorder %s20_s19, %s1854_s3  ;;  %p1860_p7 = scmp.lt.s32.totalorder %s1854_s3, %s1854_s3 }
  0x2f   :  { %p1861_p8 = por %p1860_p7, %p1859_p6 }
  0x31   :  { %p1862_p9 = pnand %p1861_p8, %p1855_p5 }
  0x33   :  { %1865 = shalt.err (!%p1862_p9)
}
  0x34   :  { %25 = dma.hbm_to_vmem [thread:$0]  %s2330_s0, 8192, %s20_s19, [#allocation3], %s1942_s30, %s1942_s30, %s1943_s6  }
  0x35   :  { %s1866_s10 = scalar_lea.hbm %s2332_s2, 16 }
  0x36   :  { %p1867_p10 = scmp.ne.s32.totalorder %s2332_s2, %s1866_s10  ;;  %p1870_p11 = scmp.lt.u32.totalorder %s1866_s10, %s2332_s2 }
  0x38   :  { %p1872_p12 = pnand %p1870_p11, %p1867_p10 }
  0x3a   :  { %1875 = shalt.err (!%p1872_p12)
}
  0x3b   :  { %s1876_s15 = scalar_lea.vmem %s45_s22, 16  ;;  %s1880_s16 = scalar_lea.vmem %s45_s22, 32 }
  0x3c   :  { %p1877_p13 = scmp.ne.s32.totalorder %s45_s22, %s1876_s15  ;;  %p1881_p0 = scmp.lt.s32.totalorder %s45_s22, %s45_s22 }
  0x3d   :  { %p1882_p1 = scmp.lt.s32.totalorder %s1880_s16, %s1876_s15 }
  0x3f   :  { %p1883_p2 = por %p1882_p1, %p1881_p0 }
  0x41   :  { %p1884_p3 = pnand %p1883_p2, %p1877_p13 }
  0x43   :  { %1887 = shalt.err (!%p1884_p3)
}
  0x44   :  { %47 = dma.hbm_to_vmem [thread:$0]  %s2332_s2, 16, %s45_s22, [#allocation6]  }
  0x45   :  { %s1946_s17 = smov [#allocation10]   ;;  %s1888_s23 = scalar_lea.hbm %s2334_s4, 16 }
  0x46   :  { %s66_s18 = sshll.u32 %s1946_s17, 4  ;;  %p1889_p4 = scmp.ne.s32.totalorder %s2334_s4, %s1888_s23  ;;  %s67_s18 = int_to_ptr.vmem [resolvable:$true] %s66_s18 }
  0x47   :  { %p1892_p5 = scmp.lt.u32.totalorder %s1888_s23, %s2334_s4 }
  0x49   :  { %p1894_p6 = pnand %p1892_p5, %p1889_p4 }
  0x4b   :  { %1897 = shalt.err (!%p1894_p6)
}
  0x4c   :  { %s1898_s28 = scalar_lea.vmem %s67_s18, 16  ;;  %s1902_s2 = scalar_lea.vmem %s67_s18, 32 }
  0x4d   :  { %p1899_p7 = scmp.ne.s32.totalorder %s67_s18, %s1898_s28  ;;  %p1903_p8 = scmp.lt.s32.totalorder %s67_s18, %s67_s18 }
  0x4e   :  { %p1904_p9 = scmp.lt.s32.totalorder %s1902_s2, %s1898_s28 }
  0x50   :  { %p1905_p10 = por %p1904_p9, %p1903_p8 }
  0x52   :  { %p1906_p11 = pnand %p1905_p10, %p1899_p7 }
  0x54   :  { %1909 = shalt.err (!%p1906_p11)
}
  0x55   :  { %69 = dma.hbm_to_vmem [thread:$0]  %s2334_s4, 16, %s67_s18, [#allocation9]  }
  0x56   :  { %1932 = dma.done.wait [#allocation3], 8192  }
  0x57   :  { %1933 = vsyncadd [#allocation3], 4294959104 }
  0x58   :  { %1934 = dma.done.wait [#allocation6], 272  }
  0x59   :  { %1935 = vsyncadd [#allocation6], 4294967024 }
  0x5a   :  { %1936 = dma.done.wait [#allocation9], 2064  }
  0x5b   :  { %1937 = vsyncadd [#allocation9], 4294965232  ;;  %vm368_vm0 = vcmask 1041408   ;;  %vm175_vm1 = vcmask 80896   ;;  %vm1947_vm2 = vmmov 1   ;;  %v149_v0 = vld [vmem:[#allocation5] sm:$0xff] }
  0x5c   :  { %vm1738_vm3 = vmpackc.low %vm368_vm0, %vm1947_vm2  ;;  %v150_v1 = vld [vmem:[#allocation5 + $0x8] sm:$0x3]  ;;  %v85_v2 = vld [vmem:[#allocation2] sm:$0xff]  ;;  %vm1212_vm4 = vcmask 326656   ;;  %s1948_s4 = smov [#allocation11]  }
  0x5d   :  { %v1737_v3 = vpack.c.bf16 %v150_v1, %v149_v0  ;;  %1513 = vmatprep.mubr.msk.f32.mxu0 %vm175_vm1, %v85_v2  ;;  %v86_v4 = vld [vmem:[#allocation2 + $0x8] sm:$0xff]  ;;  %v87_v5 = vld [vmem:[#allocation2 + $0x10] sm:$0xff]  ;;  %v88_v6 = vld [vmem:[#allocation2 + $0x18] sm:$0xff]  ;;  %s1282_s3 = sshll.u32 %s1948_s4, 4  ;;  %s1283_s3 = int_to_ptr.vmem [resolvable:$true] %s1282_s3 }
  0x5e   :  { %v89_v7 = vld [vmem:[#allocation2 + $0x20] sm:$0xff]  ;;  %v90_v8 = vld [vmem:[#allocation2 + $0x28] sm:$0xff]  ;;  %v91_v9 = vld [vmem:[#allocation2 + $0x30] sm:$0xff]  ;;  %s1910_s21 = scalar_lea.vmem %s1283_s3, 8192  ;;  %p1915_p13 = scmp.lt.s32.totalorder %s1283_s3, %s1283_s3 }
  0x5f   :  { %1739 = vmatprep.subr.msk.bf16.mxu0 %vm1738_vm3, %v1737_v3  ;;  %v92_v10 = vld [vmem:[#allocation2 + $0x38] sm:$0xff]  ;;  %v93_v11 = vld [vmem:[#allocation2 + $0x40] sm:$0xff]  ;;  %v94_v12 = vld [vmem:[#allocation2 + $0x48] sm:$0xff]  ;;  %p1911_p12 = scmp.ne.s32.totalorder %s1283_s3, %s1910_s21  ;;  %p1916_p0 = scmp.lt.s32.totalorder %s1910_s21, %s1910_s21 }
  0x60   :  { %1742 = vmatpush3.bf16.msk.msra.mxu0 %vm1738_vm3, %v1737_v3  ;;  %v95_v13 = vld [vmem:[#allocation2 + $0x50] sm:$0xff]  ;;  %v153_v15 = vld [vmem:[#allocation8 + $0x8] sm:$0xff]  ;;  %v154_v16 = vld [vmem:[#allocation8 + $0x10] sm:$0xff] }
  0x61   :  { %v152_v14 = vld [vmem:[#allocation8] sm:$0xff]  ;;  %v155_v18 = vld [vmem:[#allocation8 + $0x18] sm:$0xff]  ;;  %v157_v22 = vld [vmem:[#allocation8 + $0x28] sm:$0xff]  ;;  %p1917_p1 = por %p1916_p0, %p1915_p13 }
  0x62   :  { %v1743_v17 = vpack.c.bf16 %v153_v15, %v152_v14  ;;  %v96_v19 = vld [vmem:[#allocation2 + $0x58] sm:$0xff]  ;;  %v1747_v20 = vpack.c.bf16 %v155_v18, %v154_v16  ;;  %v97_v23 = vld [vmem:[#allocation2 + $0x60] sm:$0xff]  ;;  %v98_v25 = vld [vmem:[#allocation2 + $0x68] sm:$0xff] }
  0x63   :  { %1514 = vmatmul.mubr.msk.f32.vlgmr.msra.gmra.mrb[0].mxu0 %vm175_vm1, %v86_v4  ;;  %v156_v21 = vld [vmem:[#allocation8 + $0x20] sm:$0xff]  ;;  %v158_v26 = vld [vmem:[#allocation8 + $0x30] sm:$0xff]  ;;  %v159_v27 = vld [vmem:[#allocation8 + $0x38] sm:$0xff]  ;;  %p1918_p2 = pnand %p1917_p1, %p1911_p12 }
  0x64   :  { %1516 = vmatprep.mubr.msk.f32.mxu0 %vm175_vm1, %v87_v5  ;;  %1744 = vmatprep.subr.bf16.mxu0 %v1743_v17  ;;  %v1751_v24 = vpack.c.bf16 %v157_v22, %v156_v21  ;;  %v99_v28 = vld [vmem:[#allocation2 + $0x70] sm:$0xff]  ;;  %v1755_v29 = vpack.c.bf16 %v159_v27, %v158_v26  ;;  %v100_v30 = vld [vmem:[#allocation2 + $0x78] sm:$0xff]  ;;  %v101_v33 = vld [vmem:[#allocation2 + $0x80] sm:$0xff] }
  0x65   :  { %1775 = vmatprep.subr.bf16.mxu1 %v1743_v17  ;;  %1746 = vmatpush3.bf16.msra.mxu0 %v1743_v17  ;;  %v160_v31 = vld [vmem:[#allocation8 + $0x40] sm:$0xff]  ;;  %v161_v32 = vld [vmem:[#allocation8 + $0x48] sm:$0xff]  ;;  %v102_v35 = vld [vmem:[#allocation2 + $0x88] sm:$0xff] }
  0x66   :  { %1783 = vmatpush3.bf16.msra.mxu1 %v1743_v17  ;;  %1748 = vmatprep.subr.bf16.mxu0 %v1747_v20  ;;  %v1759_v34 = vpack.c.bf16 %v161_v32, %v160_v31  ;;  %v162_v36 = vld [vmem:[#allocation8 + $0x50] sm:$0xff]  ;;  %v163_v37 = vld [vmem:[#allocation8 + $0x58] sm:$0xff]  ;;  %v104_v40 = vld [vmem:[#allocation2 + $0x98] sm:$0xff] }
  0x67   :  { %1517 = vmatmul.mubr.msk.f32.gmra.mrb[2].mxu0 %vm175_vm1, %v88_v6  ;;  %1776 = vmatprep.subr.bf16.mxu1 %v1747_v20  ;;  %v103_v38 = vld [vmem:[#allocation2 + $0x90] sm:$0xff]  ;;  %v1763_v39 = vpack.c.bf16 %v163_v37, %v162_v36  ;;  %v165_v42 = vld [vmem:[#allocation8 + $0x68] sm:$0xff]  ;;  %v106_v45 = vld [vmem:[#allocation2 + $0xa8] sm:$0xff] }
  0x68   :  { %1519 = vmatprep.mubr.msk.f32.mxu0 %vm175_vm1, %v89_v7  ;;  %v164_v41 = vld [vmem:[#allocation8 + $0x60] sm:$0xff]  ;;  %v105_v43 = vld [vmem:[#allocation2 + $0xa0] sm:$0xff]  ;;  %v110_v49 = vld [vmem:[#allocation2 + $0xc8] sm:$0xff] }
  0x69   :  { %1750 = vmatpush3.bf16.msra.mxu0 %v1747_v20  ;;  %v1767_v44 = vpack.c.bf16 %v165_v42, %v164_v41  ;;  %v107_v46 = vld [vmem:[#allocation2 + $0xb0] sm:$0xff]  ;;  %v108_v47 = vld [vmem:[#allocation2 + $0xb8] sm:$0xff]  ;;  %v109_v48 = vld [vmem:[#allocation2 + $0xc0] sm:$0xff] }
  0x6a   :  { %1784 = vmatpush3.bf16.msra.mxu1 %v1747_v20  ;;  %1752 = vmatprep.subr.bf16.mxu0 %v1751_v24  ;;  %v111_v50 = vld [vmem:[#allocation2 + $0xd0] sm:$0xff]  ;;  %v112_v51 = vld [vmem:[#allocation2 + $0xd8] sm:$0xff]  ;;  %v113_v52 = vld [vmem:[#allocation2 + $0xe0] sm:$0xff] }
  0x6b   :  { %1520 = vmatmul.mubr.msk.f32.gmra.mrb[4].mxu0 %vm175_vm1, %v90_v8  ;;  %1777 = vmatprep.subr.bf16.mxu1 %v1751_v24  ;;  %v114_v53 = vld [vmem:[#allocation2 + $0xe8] sm:$0xff]  ;;  %v115_v54 = vld [vmem:[#allocation2 + $0xf0] sm:$0xff]  ;;  %v116_v55 = vld [vmem:[#allocation2 + $0xf8] sm:$0xff] }
  0x6c   :  { %1522 = vmatprep.mubr.msk.f32.mxu0 %vm175_vm1, %v91_v9  ;;  %v117_v56 = vld [vmem:[#allocation2 + $0x100] sm:$0xff]  ;;  %v118_v57 = vld [vmem:[#allocation2 + $0x108] sm:$0xff]  ;;  %v119_v58 = vld [vmem:[#allocation2 + $0x110] sm:$0xff] }
  0x6d   :  { %1754 = vmatpush3.bf16.msra.mxu0 %v1751_v24  ;;  %v120_v59 = vld [vmem:[#allocation2 + $0x118] sm:$0xff]  ;;  %v121_v60 = vld [vmem:[#allocation2 + $0x120] sm:$0xff]  ;;  %v122_v61 = vld [vmem:[#allocation2 + $0x128] sm:$0xff] }
  0x6e   :  { %1785 = vmatpush3.bf16.msra.mxu1 %v1751_v24  ;;  %1756 = vmatprep.subr.bf16.mxu0 %v1755_v29  ;;  %v123_v62 = vld [vmem:[#allocation2 + $0x130] sm:$0xff]  ;;  %v124_v63 = vld [vmem:[#allocation2 + $0x138] sm:$0xff]  ;;  %v125_v0 = vld [vmem:[#allocation2 + $0x140] sm:$0xff] }
  0x6f   :  { %1523 = vmatmul.mubr.msk.f32.gmra.mrb[6].mxu0 %vm175_vm1, %v92_v10  ;;  %1778 = vmatprep.subr.bf16.mxu1 %v1755_v29  ;;  %v126_v1 = vld [vmem:[#allocation2 + $0x148] sm:$0xff]  ;;  %v127_v2 = vld [vmem:[#allocation2 + $0x150] sm:$0xff]  ;;  %v128_v3 = vld [vmem:[#allocation2 + $0x158] sm:$0xff] }
  0x70   :  { %1525 = vmatprep.mubr.msk.f32.mxu0 %vm175_vm1, %v93_v11  ;;  %v129_v4 = vld [vmem:[#allocation2 + $0x160] sm:$0xff]  ;;  %v167_v6 = vld [vmem:[#allocation8 + $0x78] sm:$0xff]  ;;  %v132_v10 = vld [vmem:[#allocation2 + $0x178] sm:$0xff] }
  0x71   :  { %1758 = vmatpush3.bf16.msra.mxu0 %v1755_v29  ;;  %v166_v5 = vld [vmem:[#allocation8 + $0x70] sm:$0xff]  ;;  %v131_v9 = vld [vmem:[#allocation2 + $0x170] sm:$0xff]  ;;  %v136_v14 = vld [vmem:[#allocation2 + $0x198] sm:$0xff] }
  0x72   :  { %1786 = vmatpush3.bf16.msra.mxu1 %v1755_v29  ;;  %1760 = vmatprep.subr.bf16.mxu0 %v1759_v34  ;;  %v1771_v7 = vpack.c.bf16 %v167_v6, %v166_v5  ;;  %v130_v8 = vld [vmem:[#allocation2 + $0x168] sm:$0xff]  ;;  %v133_v11 = vld [vmem:[#allocation2 + $0x180] sm:$0xff]  ;;  %v139_v17 = vld [vmem:[#allocation2 + $0x1b0] sm:$0xff] }
  0x73   :  { %1526 = vmatmul.mubr.msk.f32.gmra.mrb[8].mxu0 %vm175_vm1, %v94_v12  ;;  %1779 = vmatprep.subr.bf16.mxu1 %v1759_v34  ;;  %v134_v12 = vld [vmem:[#allocation2 + $0x188] sm:$0xff]  ;;  %v137_v15 = vld [vmem:[#allocation2 + $0x1a0] sm:$0xff]  ;;  %v140_v18 = vld [vmem:[#allocation2 + $0x1b8] sm:$0xff] }
  0x74   :  { %1528 = vmatprep.mubr.msk.f32.mxu0 %vm175_vm1, %v95_v13  ;;  %v135_v13 = vld [vmem:[#allocation2 + $0x190] sm:$0xff]  ;;  %v138_v16 = vld [vmem:[#allocation2 + $0x1a8] sm:$0xff]  ;;  %v144_v22 = vld [vmem:[#allocation2 + $0x1d8] sm:$0xff] }
  0x75   :  { %1762 = vmatpush3.bf16.msra.mxu0 %v1759_v34  ;;  %v142_v20 = vld [vmem:[#allocation2 + $0x1c8] sm:$0xff]  ;;  %v143_v21 = vld [vmem:[#allocation2 + $0x1d0] sm:$0xff]  ;;  %v148_v26 = vld [vmem:[#allocation2 + $0x1f8] sm:$0xff] }
  0x76   :  { %1787 = vmatpush3.bf16.msra.mxu1 %v1759_v34  ;;  %1764 = vmatprep.subr.bf16.mxu0 %v1763_v39  ;;  %v146_v24 = vld [vmem:[#allocation2 + $0x1e8] sm:$0xff]  ;;  %v2119_v27 = vld [vmem:[#allocation7] ss:$0 sm:$0xff] }
  0x77   :  { %1529 = vmatmul.mubr.msk.f32.gmra.mrb[10].mxu0 %vm175_vm1, %v96_v19  ;;  %1780 = vmatprep.subr.bf16.mxu1 %v1763_v39  ;;  %v141_v19 = vld [vmem:[#allocation2 + $0x1c0] sm:$0xff] }
  0x78   :  { %1531 = vmatprep.mubr.msk.f32.mxu0 %vm175_vm1, %v97_v23  ;;  %v145_v23 = vld [vmem:[#allocation2 + $0x1e0] sm:$0xff] }
  0x79   :  { %1766 = vmatpush3.bf16.msra.mxu0 %v1763_v39 }
  0x7a   :  { %1788 = vmatpush3.bf16.msra.mxu1 %v1763_v39  ;;  %1768 = vmatprep.subr.bf16.mxu0 %v1767_v44 }
  0x7b   :  { %1532 = vmatmul.mubr.msk.f32.gmra.mrb[12].mxu0 %vm175_vm1, %v98_v25  ;;  %1781 = vmatprep.subr.bf16.mxu1 %v1767_v44  ;;  %v147_v25 = vld [vmem:[#allocation2 + $0x1f0] sm:$0xff] }
  0x7c   :  { %1534 = vmatprep.mubr.msk.f32.mxu0 %vm175_vm1, %v99_v28 }
  0x7d   :  { %1770 = vmatpush3.bf16.msra.mxu0 %v1767_v44 }
  0x7e   :  { %1789 = vmatpush3.bf16.msra.mxu1 %v1767_v44  ;;  %1772 = vmatprep.subr.bf16.mxu0 %v1771_v7 }
  0x7f   :  { %1535 = vmatmul.mubr.msk.f32.gmra.mrb[14].mxu0 %vm175_vm1, %v100_v30  ;;  %1782 = vmatprep.subr.bf16.mxu1 %v1771_v7 }
  0x80   :  { %1537 = vmatprep.mubr.msk.f32.mxu0 %vm175_vm1, %v101_v33 }
  0x81   :  { %1774 = vmatpush3.bf16.msra.mxu0 %v1771_v7 }
  0x82   :  { %1790 = vmatpush3.bf16.msra.mxu1 %v1771_v7 }
  0x83   :  { %1538 = vmatmul.mubr.msk.f32.gmra.mrb[16].mxu0 %vm175_vm1, %v102_v35 }
  0x84   :  { %1540 = vmatprep.mubr.msk.f32.mxu0 %vm175_vm1, %v103_v38 }
  0x87   :  { %1541 = vmatmul.mubr.msk.f32.gmra.mrb[18].mxu0 %vm175_vm1, %v104_v40 }
  0x88   :  { %1543 = vmatprep.mubr.msk.f32.mxu0 %vm175_vm1, %v105_v43 }
  0x8b   :  { %1544 = vmatmul.mubr.msk.f32.gmra.mrb[20].mxu0 %vm175_vm1, %v106_v45 }
  0x8c   :  { %1546 = vmatprep.mubr.msk.f32.mxu0 %vm175_vm1, %v107_v46 }
  0x8f   :  { %1547 = vmatmul.mubr.msk.f32.gmra.mrb[22].mxu0 %vm175_vm1, %v108_v47 }
  0x90   :  { %1549 = vmatprep.mubr.msk.f32.mxu0 %vm175_vm1, %v109_v48 }
  0x93   :  { %1550 = vmatmul.mubr.msk.f32.gmra.mrb[24].mxu0 %vm175_vm1, %v110_v49 }
  0x94   :  { %1552 = vmatprep.mubr.msk.f32.mxu0 %vm175_vm1, %v111_v50 }
  0x97   :  { %1553 = vmatmul.mubr.msk.f32.gmra.mrb[26].mxu0 %vm175_vm1, %v112_v51 }
  0x98   :  { %1555 = vmatprep.mubr.msk.f32.mxu0 %vm175_vm1, %v113_v52 }
  0x9b   :  { %1556 = vmatmul.mubr.msk.f32.gmra.mrb[28].mxu0 %vm175_vm1, %v114_v53 }
  0x9c   :  { %1558 = vmatprep.mubr.msk.f32.mxu0 %vm175_vm1, %v115_v54 }
  0x9f   :  { %1559 = vmatmul.mubr.msk.f32.gmra.mrb[30].mxu0 %vm175_vm1, %v116_v55 }
  0xa0   :  { %1561 = vmatprep.mubr.msk.f32.mxu0 %vm175_vm1, %v117_v56 }
  0xa3   :  { %1562 = vmatmul.mubr.msk.f32.gmra.mrb[32].mxu0 %vm175_vm1, %v118_v57 }
  0xa4   :  { %1564 = vmatprep.mubr.msk.f32.mxu0 %vm175_vm1, %v119_v58 }
  0xa7   :  { %1565 = vmatmul.mubr.msk.f32.gmra.mrb[34].mxu0 %vm175_vm1, %v120_v59 }
  0xa8   :  { %1567 = vmatprep.mubr.msk.f32.mxu0 %vm175_vm1, %v121_v60 }
  0xab   :  { %1568 = vmatmul.mubr.msk.f32.gmra.mrb[36].mxu0 %vm175_vm1, %v122_v61 }
  0xac   :  { %1570 = vmatprep.mubr.msk.f32.mxu0 %vm175_vm1, %v123_v62 }
  0xaf   :  { %1571 = vmatmul.mubr.msk.f32.gmra.mrb[38].mxu0 %vm175_vm1, %v124_v63 }
  0xb0   :  { %1573 = vmatprep.mubr.msk.f32.mxu0 %vm175_vm1, %v125_v0 }
  0xb3   :  { %1574 = vmatmul.mubr.msk.f32.gmra.mrb[40].mxu0 %vm175_vm1, %v126_v1 }
  0xb4   :  { %1576 = vmatprep.mubr.msk.f32.mxu0 %vm175_vm1, %v127_v2 }
  0xb7   :  { %1577 = vmatmul.mubr.msk.f32.gmra.mrb[42].mxu0 %vm175_vm1, %v128_v3 }
  0xb8   :  { %1579 = vmatprep.mubr.msk.f32.mxu0 %vm175_vm1, %v129_v4 }
  0xbb   :  { %1580 = vmatmul.mubr.msk.f32.gmra.mrb[44].mxu0 %vm175_vm1, %v130_v8 }
  0xbc   :  { %1582 = vmatprep.mubr.msk.f32.mxu0 %vm175_vm1, %v131_v9 }
  0xbf   :  { %1583 = vmatmul.mubr.msk.f32.gmra.mrb[46].mxu0 %vm175_vm1, %v132_v10 }
  0xc0   :  { %1585 = vmatprep.mubr.msk.f32.mxu0 %vm175_vm1, %v133_v11 }
  0xc3   :  { %1586 = vmatmul.mubr.msk.f32.gmra.mrb[48].mxu0 %vm175_vm1, %v134_v12 }
  0xc4   :  { %1588 = vmatprep.mubr.msk.f32.mxu0 %vm175_vm1, %v135_v13 }
  0xc7   :  { %1589 = vmatmul.mubr.msk.f32.gmra.mrb[50].mxu0 %vm175_vm1, %v136_v14 }
  0xc8   :  { %1591 = vmatprep.mubr.msk.f32.mxu0 %vm175_vm1, %v137_v15 }
  0xcb   :  { %1592 = vmatmul.mubr.msk.f32.gmra.mrb[52].mxu0 %vm175_vm1, %v138_v16 }
  0xcc   :  { %1594 = vmatprep.mubr.msk.f32.mxu0 %vm175_vm1, %v139_v17 }
  0xcf   :  { %1595 = vmatmul.mubr.msk.f32.gmra.mrb[54].mxu0 %vm175_vm1, %v140_v18 }
  0xd0   :  { %1597 = vmatprep.mubr.msk.f32.mxu0 %vm175_vm1, %v141_v19 }
  0xd3   :  { %1598 = vmatmul.mubr.msk.f32.gmra.mrb[56].mxu0 %vm175_vm1, %v142_v20 }
  0xd4   :  { %1600 = vmatprep.mubr.msk.f32.mxu0 %vm175_vm1, %v143_v21 }
  0xd7   :  { %1601 = vmatmul.mubr.msk.f32.gmra.mrb[58].mxu0 %vm175_vm1, %v144_v22 }
  0xd8   :  { %1603 = vmatprep.mubr.msk.f32.mxu0 %vm175_vm1, %v145_v23 }
  0xdb   :  { %1604 = vmatmul.mubr.msk.f32.gmra.mrb[60].mxu0 %vm175_vm1, %v146_v24 }
  0xdc   :  { %1606 = vmatprep.mubr.msk.f32.mxu0 %vm175_vm1, %v147_v25 }
  0xdf   :  { %1607 = vmatmul.mubr.msk.f32.gmra.mrb[62].mxu0 %vm175_vm1, %v148_v26 }
 0x136   :  { %v1515_v28 = vpop.f32.mrb[0].mxu0 }
 0x137   :  { %v444_v29 = vadd.f32 %v1515_v28, %v2119_v27  ;;  %v438_v30 = vpop.f32.mrb[1].mxu0 }
 0x138   :  { %v439_v31 = vadd.f32 %v2119_v27, %v438_v30 }
 0x139   :  { %v758_v34 = vmax.f32 %v444_v29, 0.0 }
 0x13a   :  { %v757_v32 = vmax.f32 %v439_v31, 0.0  ;;  %v1518_v33 = vpop.f32.mrb[2].mxu0 }
 0x13b   :  { %v454_v35 = vadd.f32 %v1518_v33, %v2119_v27  ;;  %v448_v36 = vpop.f32.mrb[3].mxu0 }
 0x13c   :  { %v449_v37 = vadd.f32 %v2119_v27, %v448_v36  ;;  %1641 = vmatprep.mubr.f32.mxu0 %v757_v32 }
 0x13d   :  { %1642 = vmatmul.mubr.f32.vlgmr.msra.gmra.mrb[64].mxu0 %v758_v34  ;;  %v760_v40 = vmax.f32 %v454_v35, 0.0 }
 0x13e   :  { %v759_v38 = vmax.f32 %v449_v37, 0.0  ;;  %v1521_v39 = vpop.f32.mrb[4].mxu0 }
 0x13f   :  { %v464_v41 = vadd.f32 %v1521_v39, %v2119_v27  ;;  %v458_v42 = vpop.f32.mrb[5].mxu0 }
 0x140   :  { %v459_v43 = vadd.f32 %v2119_v27, %v458_v42  ;;  %1644 = vmatprep.mubr.f32.mxu0 %v759_v38 }
 0x141   :  { %1645 = vmatmul.mubr.f32.gmra.mrb[66].mxu0 %v760_v40  ;;  %v762_v46 = vmax.f32 %v464_v41, 0.0 }
 0x142   :  { %v761_v44 = vmax.f32 %v459_v43, 0.0  ;;  %v1524_v45 = vpop.f32.mrb[6].mxu0 }
 0x143   :  { %v474_v47 = vadd.f32 %v1524_v45, %v2119_v27  ;;  %v468_v48 = vpop.f32.mrb[7].mxu0 }
 0x144   :  { %1647 = vmatprep.mubr.f32.mxu0 %v761_v44  ;;  %v469_v49 = vadd.f32 %v2119_v27, %v468_v48 }
 0x145   :  { %1648 = vmatmul.mubr.f32.gmra.mrb[68].mxu0 %v762_v46  ;;  %v764_v52 = vmax.f32 %v474_v47, 0.0 }
 0x146   :  { %v1527_v50 = vpop.f32.mrb[8].mxu0  ;;  %v763_v51 = vmax.f32 %v469_v49, 0.0 }
 0x147   :  { %v484_v53 = vadd.f32 %v1527_v50, %v2119_v27  ;;  %v478_v54 = vpop.f32.mrb[9].mxu0 }
 0x148   :  { %v479_v55 = vadd.f32 %v2119_v27, %v478_v54  ;;  %1650 = vmatprep.mubr.f32.mxu1 %v763_v51 }
 0x149   :  { %1651 = vmatmul.mubr.f32.vlgmr.msra.gmra.mrb[0].mxu1 %v764_v52  ;;  %v766_v58 = vmax.f32 %v484_v53, 0.0 }
 0x14a   :  { %v765_v56 = vmax.f32 %v479_v55, 0.0  ;;  %v1530_v57 = vpop.f32.mrb[10].mxu0 }
 0x14b   :  { %v494_v59 = vadd.f32 %v1530_v57, %v2119_v27  ;;  %v488_v60 = vpop.f32.mrb[11].mxu0 }
 0x14c   :  { %v489_v61 = vadd.f32 %v2119_v27, %v488_v60  ;;  %1653 = vmatprep.mubr.f32.mxu1 %v765_v56 }
 0x14d   :  { %1654 = vmatmul.mubr.f32.gmra.mrb[2].mxu1 %v766_v58  ;;  %v768_v0 = vmax.f32 %v494_v59, 0.0 }
 0x14e   :  { %v767_v62 = vmax.f32 %v489_v61, 0.0  ;;  %v1533_v63 = vpop.f32.mrb[12].mxu0 }
 0x14f   :  { %v504_v1 = vadd.f32 %v1533_v63, %v2119_v27  ;;  %v498_v2 = vpop.f32.mrb[13].mxu0 }
 0x150   :  { %v499_v3 = vadd.f32 %v2119_v27, %v498_v2  ;;  %1656 = vmatprep.mubr.f32.mxu1 %v767_v62 }
 0x151   :  { %1657 = vmatmul.mubr.f32.gmra.mrb[4].mxu1 %v768_v0  ;;  %v770_v6 = vmax.f32 %v504_v1, 0.0 }
 0x152   :  { %v769_v4 = vmax.f32 %v499_v3, 0.0  ;;  %v1536_v5 = vpop.f32.mrb[14].mxu0 }
 0x153   :  { %v514_v7 = vadd.f32 %v1536_v5, %v2119_v27  ;;  %v508_v8 = vpop.f32.mrb[15].mxu0 }
 0x154   :  { %v509_v9 = vadd.f32 %v2119_v27, %v508_v8  ;;  %1659 = vmatprep.mubr.f32.mxu1 %v769_v4 }
 0x155   :  { %1660 = vmatmul.mubr.f32.gmra.mrb[6].mxu1 %v770_v6  ;;  %v772_v12 = vmax.f32 %v514_v7, 0.0 }
 0x156   :  { %v771_v10 = vmax.f32 %v509_v9, 0.0  ;;  %v1539_v11 = vpop.f32.mrb[16].mxu0 }
 0x157   :  { %v524_v13 = vadd.f32 %v1539_v11, %v2119_v27  ;;  %v518_v14 = vpop.f32.mrb[17].mxu0 }
 0x158   :  { %v519_v15 = vadd.f32 %v2119_v27, %v518_v14  ;;  %1662 = vmatprep.mubr.f32.mxu1 %v771_v10 }
 0x159   :  { %1663 = vmatmul.mubr.f32.gmra.mrb[8].mxu1 %v772_v12  ;;  %v774_v18 = vmax.f32 %v524_v13, 0.0 }
 0x15a   :  { %v773_v16 = vmax.f32 %v519_v15, 0.0  ;;  %v1542_v17 = vpop.f32.mrb[18].mxu0 }
 0x15b   :  { %v534_v19 = vadd.f32 %v1542_v17, %v2119_v27  ;;  %v528_v20 = vpop.f32.mrb[19].mxu0 }
 0x15c   :  { %v529_v21 = vadd.f32 %v2119_v27, %v528_v20  ;;  %1665 = vmatprep.mubr.f32.mxu1 %v773_v16 }
 0x15d   :  { %1666 = vmatmul.mubr.f32.gmra.mrb[10].mxu1 %v774_v18  ;;  %v776_v24 = vmax.f32 %v534_v19, 0.0 }
 0x15e   :  { %v775_v22 = vmax.f32 %v529_v21, 0.0  ;;  %v1545_v23 = vpop.f32.mrb[20].mxu0 }
 0x15f   :  { %v544_v25 = vadd.f32 %v1545_v23, %v2119_v27  ;;  %v538_v26 = vpop.f32.mrb[21].mxu0 }
 0x160   :  { %v539_v28 = vadd.f32 %v2119_v27, %v538_v26  ;;  %1668 = vmatprep.mubr.f32.mxu1 %v775_v22 }
 0x161   :  { %1669 = vmatmul.mubr.f32.gmra.mrb[12].mxu1 %v776_v24  ;;  %v778_v31 = vmax.f32 %v544_v25, 0.0 }
 0x162   :  { %v777_v29 = vmax.f32 %v539_v28, 0.0  ;;  %v1548_v30 = vpop.f32.mrb[22].mxu0 }
 0x163   :  { %v554_v32 = vadd.f32 %v1548_v30, %v2119_v27  ;;  %v548_v33 = vpop.f32.mrb[23].mxu0 }
 0x164   :  { %v549_v34 = vadd.f32 %v2119_v27, %v548_v33  ;;  %1671 = vmatprep.mubr.f32.mxu1 %v777_v29 }
 0x165   :  { %1672 = vmatmul.mubr.f32.gmra.mrb[14].mxu1 %v778_v31  ;;  %v780_v37 = vmax.f32 %v554_v32, 0.0 }
 0x166   :  { %v779_v35 = vmax.f32 %v549_v34, 0.0  ;;  %v1551_v36 = vpop.f32.mrb[24].mxu0 }
 0x167   :  { %v564_v38 = vadd.f32 %v1551_v36, %v2119_v27  ;;  %v558_v39 = vpop.f32.mrb[25].mxu0 }
 0x168   :  { %v559_v40 = vadd.f32 %v2119_v27, %v558_v39  ;;  %1674 = vmatprep.mubr.f32.mxu1 %v779_v35 }
 0x169   :  { %1675 = vmatmul.mubr.f32.gmra.mrb[16].mxu1 %v780_v37  ;;  %v782_v43 = vmax.f32 %v564_v38, 0.0 }
 0x16a   :  { %v781_v41 = vmax.f32 %v559_v40, 0.0  ;;  %v1554_v42 = vpop.f32.mrb[26].mxu0 }
 0x16b   :  { %v574_v44 = vadd.f32 %v1554_v42, %v2119_v27  ;;  %v568_v45 = vpop.f32.mrb[27].mxu0 }
 0x16c   :  { %v569_v46 = vadd.f32 %v2119_v27, %v568_v45  ;;  %1677 = vmatprep.mubr.f32.mxu1 %v781_v41 }
 0x16d   :  { %1678 = vmatmul.mubr.f32.gmra.mrb[18].mxu1 %v782_v43  ;;  %v784_v49 = vmax.f32 %v574_v44, 0.0 }
 0x16e   :  { %v783_v47 = vmax.f32 %v569_v46, 0.0  ;;  %v1557_v48 = vpop.f32.mrb[28].mxu0 }
 0x16f   :  { %v584_v50 = vadd.f32 %v1557_v48, %v2119_v27  ;;  %v578_v51 = vpop.f32.mrb[29].mxu0 }
 0x170   :  { %v579_v52 = vadd.f32 %v2119_v27, %v578_v51  ;;  %1680 = vmatprep.mubr.f32.mxu1 %v783_v47 }
 0x171   :  { %1681 = vmatmul.mubr.f32.gmra.mrb[20].mxu1 %v784_v49  ;;  %v786_v55 = vmax.f32 %v584_v50, 0.0 }
 0x172   :  { %v785_v53 = vmax.f32 %v579_v52, 0.0  ;;  %v1560_v54 = vpop.f32.mrb[30].mxu0 }
 0x173   :  { %v594_v56 = vadd.f32 %v1560_v54, %v2119_v27  ;;  %v588_v57 = vpop.f32.mrb[31].mxu0 }
 0x174   :  { %v589_v58 = vadd.f32 %v2119_v27, %v588_v57  ;;  %1683 = vmatprep.mubr.f32.mxu1 %v785_v53 }
 0x175   :  { %1684 = vmatmul.mubr.f32.gmra.mrb[22].mxu1 %v786_v55  ;;  %v788_v61 = vmax.f32 %v594_v56, 0.0 }
 0x176   :  { %v787_v59 = vmax.f32 %v589_v58, 0.0  ;;  %v1563_v60 = vpop.f32.mrb[32].mxu0 }
 0x177   :  { %v604_v62 = vadd.f32 %v1563_v60, %v2119_v27  ;;  %v598_v63 = vpop.f32.mrb[33].mxu0 }
 0x178   :  { %v599_v0 = vadd.f32 %v2119_v27, %v598_v63  ;;  %1686 = vmatprep.mubr.f32.mxu1 %v787_v59 }
 0x179   :  { %1687 = vmatmul.mubr.f32.gmra.mrb[24].mxu1 %v788_v61  ;;  %v790_v3 = vmax.f32 %v604_v62, 0.0 }
 0x17a   :  { %v789_v1 = vmax.f32 %v599_v0, 0.0  ;;  %v1566_v2 = vpop.f32.mrb[34].mxu0 }
 0x17b   :  { %v614_v4 = vadd.f32 %v1566_v2, %v2119_v27  ;;  %v608_v5 = vpop.f32.mrb[35].mxu0 }
 0x17c   :  { %v609_v6 = vadd.f32 %v2119_v27, %v608_v5  ;;  %1689 = vmatprep.mubr.f32.mxu1 %v789_v1 }
 0x17d   :  { %1690 = vmatmul.mubr.f32.gmra.mrb[26].mxu1 %v790_v3  ;;  %v792_v9 = vmax.f32 %v614_v4, 0.0 }
 0x17e   :  { %v791_v7 = vmax.f32 %v609_v6, 0.0  ;;  %v1569_v8 = vpop.f32.mrb[36].mxu0 }
 0x17f   :  { %v624_v10 = vadd.f32 %v1569_v8, %v2119_v27  ;;  %v618_v11 = vpop.f32.mrb[37].mxu0 }
 0x180   :  { %v619_v12 = vadd.f32 %v2119_v27, %v618_v11  ;;  %1692 = vmatprep.mubr.f32.mxu1 %v791_v7 }
 0x181   :  { %1693 = vmatmul.mubr.f32.gmra.mrb[28].mxu1 %v792_v9  ;;  %v794_v15 = vmax.f32 %v624_v10, 0.0 }
 0x182   :  { %v793_v13 = vmax.f32 %v619_v12, 0.0  ;;  %v1572_v14 = vpop.f32.mrb[38].mxu0 }
 0x183   :  { %v634_v16 = vadd.f32 %v1572_v14, %v2119_v27  ;;  %v628_v17 = vpop.f32.mrb[39].mxu0 }
 0x184   :  { %v629_v18 = vadd.f32 %v2119_v27, %v628_v17  ;;  %1695 = vmatprep.mubr.f32.mxu1 %v793_v13 }
 0x185   :  { %1696 = vmatmul.mubr.f32.gmra.mrb[30].mxu1 %v794_v15  ;;  %v796_v21 = vmax.f32 %v634_v16, 0.0 }
 0x186   :  { %v795_v19 = vmax.f32 %v629_v18, 0.0  ;;  %v1575_v20 = vpop.f32.mrb[40].mxu0 }
 0x187   :  { %v644_v22 = vadd.f32 %v1575_v20, %v2119_v27  ;;  %v638_v23 = vpop.f32.mrb[41].mxu0 }
 0x188   :  { %v639_v24 = vadd.f32 %v2119_v27, %v638_v23  ;;  %1698 = vmatprep.mubr.f32.mxu1 %v795_v19 }
 0x189   :  { %1699 = vmatmul.mubr.f32.gmra.mrb[32].mxu1 %v796_v21  ;;  %v798_v28 = vmax.f32 %v644_v22, 0.0 }
 0x18a   :  { %v797_v25 = vmax.f32 %v639_v24, 0.0  ;;  %v1578_v26 = vpop.f32.mrb[42].mxu0 }
 0x18b   :  { %v654_v29 = vadd.f32 %v1578_v26, %v2119_v27  ;;  %v648_v30 = vpop.f32.mrb[43].mxu0 }
 0x18c   :  { %v649_v31 = vadd.f32 %v2119_v27, %v648_v30  ;;  %1701 = vmatprep.mubr.f32.mxu1 %v797_v25 }
 0x18d   :  { %1702 = vmatmul.mubr.f32.gmra.mrb[34].mxu1 %v798_v28  ;;  %v800_v34 = vmax.f32 %v654_v29, 0.0 }
 0x18e   :  { %v799_v32 = vmax.f32 %v649_v31, 0.0  ;;  %v1581_v33 = vpop.f32.mrb[44].mxu0  ;;  %v2185_v31 = vld [vmem:[#allocation10] ss:$0 sm:$0xff] }
 0x18f   :  { %v664_v35 = vadd.f32 %v1581_v33, %v2119_v27  ;;  %v658_v36 = vpop.f32.mrb[45].mxu0 }
 0x190   :  { %v659_v37 = vadd.f32 %v2119_v27, %v658_v36  ;;  %1704 = vmatprep.mubr.f32.mxu1 %v799_v32 }
 0x191   :  { %1705 = vmatmul.mubr.f32.gmra.mrb[36].mxu1 %v800_v34  ;;  %v802_v40 = vmax.f32 %v664_v35, 0.0 }
 0x192   :  { %v801_v38 = vmax.f32 %v659_v37, 0.0  ;;  %v1584_v39 = vpop.f32.mrb[46].mxu0 }
 0x193   :  { %v674_v41 = vadd.f32 %v1584_v39, %v2119_v27  ;;  %v668_v42 = vpop.f32.mrb[47].mxu0 }
 0x194   :  { %v669_v43 = vadd.f32 %v2119_v27, %v668_v42  ;;  %1707 = vmatprep.mubr.f32.mxu1 %v801_v38 }
 0x195   :  { %1708 = vmatmul.mubr.f32.gmra.mrb[38].mxu1 %v802_v40  ;;  %v804_v46 = vmax.f32 %v674_v41, 0.0 }
 0x196   :  { %v803_v44 = vmax.f32 %v669_v43, 0.0  ;;  %v1587_v45 = vpop.f32.mrb[48].mxu0 }
 0x197   :  { %v684_v47 = vadd.f32 %v1587_v45, %v2119_v27  ;;  %v678_v48 = vpop.f32.mrb[49].mxu0 }
 0x198   :  { %v679_v49 = vadd.f32 %v2119_v27, %v678_v48  ;;  %1710 = vmatprep.mubr.f32.mxu1 %v803_v44 }
 0x199   :  { %1711 = vmatmul.mubr.f32.gmra.mrb[40].mxu1 %v804_v46  ;;  %v806_v52 = vmax.f32 %v684_v47, 0.0 }
 0x19a   :  { %v805_v50 = vmax.f32 %v679_v49, 0.0  ;;  %v1590_v51 = vpop.f32.mrb[50].mxu0 }
 0x19b   :  { %v694_v53 = vadd.f32 %v1590_v51, %v2119_v27  ;;  %v688_v54 = vpop.f32.mrb[51].mxu0 }
 0x19c   :  { %v689_v55 = vadd.f32 %v2119_v27, %v688_v54  ;;  %1713 = vmatprep.mubr.f32.mxu1 %v805_v50 }
 0x19d   :  { %1714 = vmatmul.mubr.f32.gmra.mrb[42].mxu1 %v806_v52  ;;  %v808_v58 = vmax.f32 %v694_v53, 0.0 }
 0x19e   :  { %v807_v56 = vmax.f32 %v689_v55, 0.0  ;;  %v1593_v57 = vpop.f32.mrb[52].mxu0 }
 0x19f   :  { %v704_v59 = vadd.f32 %v1593_v57, %v2119_v27  ;;  %v698_v60 = vpop.f32.mrb[53].mxu0 }
 0x1a0   :  { %v699_v61 = vadd.f32 %v2119_v27, %v698_v60  ;;  %1716 = vmatprep.mubr.f32.mxu1 %v807_v56 }
 0x1a1   :  { %1717 = vmatmul.mubr.f32.gmra.mrb[44].mxu1 %v808_v58  ;;  %v810_v0 = vmax.f32 %v704_v59, 0.0 }
 0x1a2   :  { %v809_v62 = vmax.f32 %v699_v61, 0.0  ;;  %v1596_v63 = vpop.f32.mrb[54].mxu0 }
 0x1a3   :  { %v714_v1 = vadd.f32 %v1596_v63, %v2119_v27  ;;  %v708_v2 = vpop.f32.mrb[55].mxu0 }
 0x1a4   :  { %v709_v3 = vadd.f32 %v2119_v27, %v708_v2  ;;  %1719 = vmatprep.mubr.f32.mxu1 %v809_v62 }
 0x1a5   :  { %1720 = vmatmul.mubr.f32.gmra.mrb[46].mxu1 %v810_v0  ;;  %v812_v6 = vmax.f32 %v714_v1, 0.0 }
 0x1a6   :  { %v811_v4 = vmax.f32 %v709_v3, 0.0  ;;  %v1599_v5 = vpop.f32.mrb[56].mxu0 }
 0x1a7   :  { %v724_v7 = vadd.f32 %v1599_v5, %v2119_v27  ;;  %v718_v8 = vpop.f32.mrb[57].mxu0 }
 0x1a8   :  { %v719_v9 = vadd.f32 %v2119_v27, %v718_v8  ;;  %1722 = vmatprep.mubr.f32.mxu1 %v811_v4 }
 0x1a9   :  { %1723 = vmatmul.mubr.f32.gmra.mrb[48].mxu1 %v812_v6  ;;  %v814_v12 = vmax.f32 %v724_v7, 0.0 }
 0x1aa   :  { %v813_v10 = vmax.f32 %v719_v9, 0.0  ;;  %v1602_v11 = vpop.f32.mrb[58].mxu0 }
 0x1ab   :  { %v734_v13 = vadd.f32 %v1602_v11, %v2119_v27  ;;  %v728_v14 = vpop.f32.mrb[59].mxu0 }
 0x1ac   :  { %v729_v15 = vadd.f32 %v2119_v27, %v728_v14  ;;  %1725 = vmatprep.mubr.f32.mxu1 %v813_v10 }
 0x1ad   :  { %1726 = vmatmul.mubr.f32.gmra.mrb[50].mxu1 %v814_v12  ;;  %v816_v18 = vmax.f32 %v734_v13, 0.0 }
 0x1ae   :  { %v815_v16 = vmax.f32 %v729_v15, 0.0  ;;  %v1605_v17 = vpop.f32.mrb[60].mxu0 }
 0x1af   :  { %v744_v19 = vadd.f32 %v1605_v17, %v2119_v27  ;;  %v738_v20 = vpop.f32.mrb[61].mxu0 }
 0x1b0   :  { %v739_v21 = vadd.f32 %v2119_v27, %v738_v20  ;;  %1728 = vmatprep.mubr.f32.mxu1 %v815_v16 }
 0x1b1   :  { %1729 = vmatmul.mubr.f32.gmra.mrb[52].mxu1 %v816_v18  ;;  %v818_v24 = vmax.f32 %v744_v19, 0.0 }
 0x1b2   :  { %v817_v22 = vmax.f32 %v739_v21, 0.0  ;;  %v1608_v23 = vpop.f32.mrb[62].mxu0 }
 0x1b3   :  { %v754_v25 = vadd.f32 %v1608_v23, %v2119_v27  ;;  %v748_v26 = vpop.f32.mrb[63].mxu0 }
 0x1b4   :  { %v749_v28 = vadd.f32 %v2119_v27, %v748_v26  ;;  %1731 = vmatprep.mubr.f32.mxu1 %v817_v22 }
 0x1b5   :  { %1732 = vmatmul.mubr.f32.gmra.mrb[54].mxu1 %v818_v24  ;;  %v820_v30 = vmax.f32 %v754_v25, 0.0 }
 0x1b6   :  { %v819_v29 = vmax.f32 %v749_v28, 0.0 }
 0x1b8   :  { %1734 = vmatprep.mubr.f32.mxu1 %v819_v29 }
 0x1b9   :  { %1735 = vmatmul.mubr.f32.gmra.mrb[56].mxu1 %v820_v30 }
 0x210   :  { %v1643_v32 = vpop.f32.mrb[64].mxu0 }
 0x211   :  { %v899_v33 = vadd.f32 %v1643_v32, %v2185_v31  ;;  %v893_v34 = vpop.f32.mrb[65].mxu0 }
 0x212   :  { %v894_v35 = vadd.f32 %v2185_v31, %v893_v34 }
 0x213   :  { %1214 = vst.msk [vmem:[#allocation11 + $0x8] sm:$0xff] %vm1212_vm4, %v899_v33 }
 0x214   :  { %1213 = vst.msk [vmem:[#allocation11] sm:$0xff] %vm1212_vm4, %v894_v35  ;;  %v1646_v27 = vpop.f32.mrb[66].mxu0 }
 0x215   :  { %v909_v36 = vadd.f32 %v1646_v27, %v2185_v31  ;;  %v903_v37 = vpop.f32.mrb[67].mxu0 }
 0x216   :  { %v904_v38 = vadd.f32 %v2185_v31, %v903_v37 }
 0x217   :  { %1216 = vst.msk [vmem:[#allocation11 + $0x18] sm:$0xff] %vm1212_vm4, %v909_v36 }
 0x218   :  { %1215 = vst.msk [vmem:[#allocation11 + $0x10] sm:$0xff] %vm1212_vm4, %v904_v38  ;;  %v1649_v39 = vpop.f32.mrb[68].mxu0 }
 0x219   :  { %v919_v40 = vadd.f32 %v1649_v39, %v2185_v31  ;;  %v913_v41 = vpop.f32.mrb[69].mxu0 }
 0x21a   :  { %v914_v42 = vadd.f32 %v2185_v31, %v913_v41 }
 0x21b   :  { %1218 = vst.msk [vmem:[#allocation11 + $0x28] sm:$0xff] %vm1212_vm4, %v919_v40 }
 0x21c   :  { %1217 = vst.msk [vmem:[#allocation11 + $0x20] sm:$0xff] %vm1212_vm4, %v914_v42  ;;  %v1652_v43 = vpop.f32.mrb[0].mxu1 }
 0x21d   :  { %v929_v44 = vadd.f32 %v1652_v43, %v2185_v31  ;;  %v923_v45 = vpop.f32.mrb[1].mxu1 }
 0x21e   :  { %v924_v46 = vadd.f32 %v2185_v31, %v923_v45 }
 0x21f   :  { %1220 = vst.msk [vmem:[#allocation11 + $0x38] sm:$0xff] %vm1212_vm4, %v929_v44 }
 0x220   :  { %1219 = vst.msk [vmem:[#allocation11 + $0x30] sm:$0xff] %vm1212_vm4, %v924_v46  ;;  %v1655_v47 = vpop.f32.mrb[2].mxu1 }
 0x221   :  { %v939_v48 = vadd.f32 %v1655_v47, %v2185_v31  ;;  %v933_v49 = vpop.f32.mrb[3].mxu1 }
 0x222   :  { %v934_v50 = vadd.f32 %v2185_v31, %v933_v49 }
 0x223   :  { %1222 = vst.msk [vmem:[#allocation11 + $0x48] sm:$0xff] %vm1212_vm4, %v939_v48 }
 0x224   :  { %1221 = vst.msk [vmem:[#allocation11 + $0x40] sm:$0xff] %vm1212_vm4, %v934_v50  ;;  %v1658_v51 = vpop.f32.mrb[4].mxu1 }
 0x225   :  { %v949_v52 = vadd.f32 %v1658_v51, %v2185_v31  ;;  %v943_v53 = vpop.f32.mrb[5].mxu1 }
 0x226   :  { %v944_v54 = vadd.f32 %v2185_v31, %v943_v53 }
 0x227   :  { %1224 = vst.msk [vmem:[#allocation11 + $0x58] sm:$0xff] %vm1212_vm4, %v949_v52 }
 0x228   :  { %1223 = vst.msk [vmem:[#allocation11 + $0x50] sm:$0xff] %vm1212_vm4, %v944_v54  ;;  %v1661_v55 = vpop.f32.mrb[6].mxu1 }
 0x229   :  { %v959_v56 = vadd.f32 %v1661_v55, %v2185_v31  ;;  %v953_v57 = vpop.f32.mrb[7].mxu1 }
 0x22a   :  { %v954_v58 = vadd.f32 %v2185_v31, %v953_v57 }
 0x22b   :  { %1226 = vst.msk [vmem:[#allocation11 + $0x68] sm:$0xff] %vm1212_vm4, %v959_v56 }
 0x22c   :  { %1225 = vst.msk [vmem:[#allocation11 + $0x60] sm:$0xff] %vm1212_vm4, %v954_v58  ;;  %v1664_v59 = vpop.f32.mrb[8].mxu1 }
 0x22d   :  { %v969_v60 = vadd.f32 %v1664_v59, %v2185_v31  ;;  %v963_v61 = vpop.f32.mrb[9].mxu1 }
 0x22e   :  { %v964_v62 = vadd.f32 %v2185_v31, %v963_v61 }
 0x22f   :  { %1228 = vst.msk [vmem:[#allocation11 + $0x78] sm:$0xff] %vm1212_vm4, %v969_v60 }
 0x230   :  { %1227 = vst.msk [vmem:[#allocation11 + $0x70] sm:$0xff] %vm1212_vm4, %v964_v62  ;;  %v1667_v63 = vpop.f32.mrb[10].mxu1 }
 0x231   :  { %v979_v0 = vadd.f32 %v1667_v63, %v2185_v31  ;;  %v973_v1 = vpop.f32.mrb[11].mxu1 }
 0x232   :  { %v974_v2 = vadd.f32 %v2185_v31, %v973_v1 }
 0x233   :  { %1230 = vst.msk [vmem:[#allocation11 + $0x88] sm:$0xff] %vm1212_vm4, %v979_v0 }
 0x234   :  { %1229 = vst.msk [vmem:[#allocation11 + $0x80] sm:$0xff] %vm1212_vm4, %v974_v2  ;;  %v1670_v3 = vpop.f32.mrb[12].mxu1 }
 0x235   :  { %v989_v4 = vadd.f32 %v1670_v3, %v2185_v31  ;;  %v983_v5 = vpop.f32.mrb[13].mxu1 }
 0x236   :  { %v984_v6 = vadd.f32 %v2185_v31, %v983_v5 }
 0x237   :  { %1232 = vst.msk [vmem:[#allocation11 + $0x98] sm:$0xff] %vm1212_vm4, %v989_v4 }
 0x238   :  { %1231 = vst.msk [vmem:[#allocation11 + $0x90] sm:$0xff] %vm1212_vm4, %v984_v6  ;;  %v1673_v7 = vpop.f32.mrb[14].mxu1 }
 0x239   :  { %v999_v8 = vadd.f32 %v1673_v7, %v2185_v31  ;;  %v993_v9 = vpop.f32.mrb[15].mxu1 }
 0x23a   :  { %v994_v10 = vadd.f32 %v2185_v31, %v993_v9 }
 0x23b   :  { %1234 = vst.msk [vmem:[#allocation11 + $0xa8] sm:$0xff] %vm1212_vm4, %v999_v8 }
 0x23c   :  { %1233 = vst.msk [vmem:[#allocation11 + $0xa0] sm:$0xff] %vm1212_vm4, %v994_v10  ;;  %v1676_v11 = vpop.f32.mrb[16].mxu1 }
 0x23d   :  { %v1009_v12 = vadd.f32 %v1676_v11, %v2185_v31  ;;  %v1003_v13 = vpop.f32.mrb[17].mxu1 }
 0x23e   :  { %v1004_v14 = vadd.f32 %v2185_v31, %v1003_v13 }
 0x23f   :  { %1236 = vst.msk [vmem:[#allocation11 + $0xb8] sm:$0xff] %vm1212_vm4, %v1009_v12 }
 0x240   :  { %1235 = vst.msk [vmem:[#allocation11 + $0xb0] sm:$0xff] %vm1212_vm4, %v1004_v14  ;;  %v1679_v15 = vpop.f32.mrb[18].mxu1 }
 0x241   :  { %v1019_v16 = vadd.f32 %v1679_v15, %v2185_v31  ;;  %v1013_v17 = vpop.f32.mrb[19].mxu1 }
 0x242   :  { %v1014_v18 = vadd.f32 %v2185_v31, %v1013_v17 }
 0x243   :  { %1238 = vst.msk [vmem:[#allocation11 + $0xc8] sm:$0xff] %vm1212_vm4, %v1019_v16 }
 0x244   :  { %1237 = vst.msk [vmem:[#allocation11 + $0xc0] sm:$0xff] %vm1212_vm4, %v1014_v18  ;;  %v1682_v19 = vpop.f32.mrb[20].mxu1 }
 0x245   :  { %v1029_v20 = vadd.f32 %v1682_v19, %v2185_v31  ;;  %v1023_v21 = vpop.f32.mrb[21].mxu1 }
 0x246   :  { %v1024_v22 = vadd.f32 %v2185_v31, %v1023_v21 }
 0x247   :  { %1240 = vst.msk [vmem:[#allocation11 + $0xd8] sm:$0xff] %vm1212_vm4, %v1029_v20 }
 0x248   :  { %1239 = vst.msk [vmem:[#allocation11 + $0xd0] sm:$0xff] %vm1212_vm4, %v1024_v22  ;;  %v1685_v23 = vpop.f32.mrb[22].mxu1 }
 0x249   :  { %v1039_v24 = vadd.f32 %v1685_v23, %v2185_v31  ;;  %v1033_v25 = vpop.f32.mrb[23].mxu1 }
 0x24a   :  { %v1034_v26 = vadd.f32 %v2185_v31, %v1033_v25 }
 0x24b   :  { %1242 = vst.msk [vmem:[#allocation11 + $0xe8] sm:$0xff] %vm1212_vm4, %v1039_v24 }
 0x24c   :  { %1241 = vst.msk [vmem:[#allocation11 + $0xe0] sm:$0xff] %vm1212_vm4, %v1034_v26  ;;  %v1688_v28 = vpop.f32.mrb[24].mxu1 }
 0x24d   :  { %v1049_v29 = vadd.f32 %v1688_v28, %v2185_v31  ;;  %v1043_v30 = vpop.f32.mrb[25].mxu1 }
 0x24e   :  { %v1044_v32 = vadd.f32 %v2185_v31, %v1043_v30 }
 0x24f   :  { %1244 = vst.msk [vmem:[#allocation11 + $0xf8] sm:$0xff] %vm1212_vm4, %v1049_v29 }
 0x250   :  { %1243 = vst.msk [vmem:[#allocation11 + $0xf0] sm:$0xff] %vm1212_vm4, %v1044_v32  ;;  %v1691_v33 = vpop.f32.mrb[26].mxu1 }
 0x251   :  { %v1059_v34 = vadd.f32 %v1691_v33, %v2185_v31  ;;  %v1053_v35 = vpop.f32.mrb[27].mxu1 }
 0x252   :  { %v1054_v27 = vadd.f32 %v2185_v31, %v1053_v35 }
 0x253   :  { %1246 = vst.msk [vmem:[#allocation11 + $0x108] sm:$0xff] %vm1212_vm4, %v1059_v34 }
 0x254   :  { %1245 = vst.msk [vmem:[#allocation11 + $0x100] sm:$0xff] %vm1212_vm4, %v1054_v27  ;;  %v1694_v36 = vpop.f32.mrb[28].mxu1 }
 0x255   :  { %v1069_v37 = vadd.f32 %v1694_v36, %v2185_v31  ;;  %v1063_v38 = vpop.f32.mrb[29].mxu1 }
 0x256   :  { %v1064_v39 = vadd.f32 %v2185_v31, %v1063_v38 }
 0x257   :  { %1248 = vst.msk [vmem:[#allocation11 + $0x118] sm:$0xff] %vm1212_vm4, %v1069_v37 }
 0x258   :  { %1247 = vst.msk [vmem:[#allocation11 + $0x110] sm:$0xff] %vm1212_vm4, %v1064_v39  ;;  %v1697_v40 = vpop.f32.mrb[30].mxu1 }
 0x259   :  { %v1079_v41 = vadd.f32 %v1697_v40, %v2185_v31  ;;  %v1073_v42 = vpop.f32.mrb[31].mxu1 }
 0x25a   :  { %v1074_v43 = vadd.f32 %v2185_v31, %v1073_v42 }
 0x25b   :  { %1250 = vst.msk [vmem:[#allocation11 + $0x128] sm:$0xff] %vm1212_vm4, %v1079_v41 }
 0x25c   :  { %1249 = vst.msk [vmem:[#allocation11 + $0x120] sm:$0xff] %vm1212_vm4, %v1074_v43  ;;  %v1700_v44 = vpop.f32.mrb[32].mxu1 }
 0x25d   :  { %v1089_v45 = vadd.f32 %v1700_v44, %v2185_v31  ;;  %v1083_v46 = vpop.f32.mrb[33].mxu1 }
 0x25e   :  { %v1084_v47 = vadd.f32 %v2185_v31, %v1083_v46 }
 0x25f   :  { %1252 = vst.msk [vmem:[#allocation11 + $0x138] sm:$0xff] %vm1212_vm4, %v1089_v45 }
 0x260   :  { %1251 = vst.msk [vmem:[#allocation11 + $0x130] sm:$0xff] %vm1212_vm4, %v1084_v47  ;;  %v1703_v48 = vpop.f32.mrb[34].mxu1 }
 0x261   :  { %v1099_v49 = vadd.f32 %v1703_v48, %v2185_v31  ;;  %v1093_v50 = vpop.f32.mrb[35].mxu1 }
 0x262   :  { %v1094_v51 = vadd.f32 %v2185_v31, %v1093_v50 }
 0x263   :  { %1254 = vst.msk [vmem:[#allocation11 + $0x148] sm:$0xff] %vm1212_vm4, %v1099_v49 }
 0x264   :  { %1253 = vst.msk [vmem:[#allocation11 + $0x140] sm:$0xff] %vm1212_vm4, %v1094_v51  ;;  %v1706_v52 = vpop.f32.mrb[36].mxu1 }
 0x265   :  { %v1109_v53 = vadd.f32 %v1706_v52, %v2185_v31  ;;  %v1103_v54 = vpop.f32.mrb[37].mxu1 }
 0x266   :  { %v1104_v55 = vadd.f32 %v2185_v31, %v1103_v54 }
 0x267   :  { %1256 = vst.msk [vmem:[#allocation11 + $0x158] sm:$0xff] %vm1212_vm4, %v1109_v53 }
 0x268   :  { %1255 = vst.msk [vmem:[#allocation11 + $0x150] sm:$0xff] %vm1212_vm4, %v1104_v55  ;;  %v1709_v56 = vpop.f32.mrb[38].mxu1 }
 0x269   :  { %v1119_v57 = vadd.f32 %v1709_v56, %v2185_v31  ;;  %v1113_v58 = vpop.f32.mrb[39].mxu1 }
 0x26a   :  { %v1114_v59 = vadd.f32 %v2185_v31, %v1113_v58 }
 0x26b   :  { %1258 = vst.msk [vmem:[#allocation11 + $0x168] sm:$0xff] %vm1212_vm4, %v1119_v57 }
 0x26c   :  { %1257 = vst.msk [vmem:[#allocation11 + $0x160] sm:$0xff] %vm1212_vm4, %v1114_v59  ;;  %v1712_v60 = vpop.f32.mrb[40].mxu1 }
 0x26d   :  { %v1129_v61 = vadd.f32 %v1712_v60, %v2185_v31  ;;  %v1123_v62 = vpop.f32.mrb[41].mxu1 }
 0x26e   :  { %v1124_v63 = vadd.f32 %v2185_v31, %v1123_v62 }
 0x26f   :  { %1260 = vst.msk [vmem:[#allocation11 + $0x178] sm:$0xff] %vm1212_vm4, %v1129_v61 }
 0x270   :  { %1259 = vst.msk [vmem:[#allocation11 + $0x170] sm:$0xff] %vm1212_vm4, %v1124_v63  ;;  %v1715_v0 = vpop.f32.mrb[42].mxu1 }
 0x271   :  { %v1139_v1 = vadd.f32 %v1715_v0, %v2185_v31  ;;  %v1133_v2 = vpop.f32.mrb[43].mxu1 }
 0x272   :  { %v1134_v3 = vadd.f32 %v2185_v31, %v1133_v2 }
 0x273   :  { %1262 = vst.msk [vmem:[#allocation11 + $0x188] sm:$0xff] %vm1212_vm4, %v1139_v1 }
 0x274   :  { %1261 = vst.msk [vmem:[#allocation11 + $0x180] sm:$0xff] %vm1212_vm4, %v1134_v3  ;;  %v1718_v4 = vpop.f32.mrb[44].mxu1 }
 0x275   :  { %v1149_v5 = vadd.f32 %v1718_v4, %v2185_v31  ;;  %v1143_v6 = vpop.f32.mrb[45].mxu1 }
 0x276   :  { %v1144_v7 = vadd.f32 %v2185_v31, %v1143_v6 }
 0x277   :  { %1264 = vst.msk [vmem:[#allocation11 + $0x198] sm:$0xff] %vm1212_vm4, %v1149_v5 }
 0x278   :  { %1263 = vst.msk [vmem:[#allocation11 + $0x190] sm:$0xff] %vm1212_vm4, %v1144_v7  ;;  %v1721_v8 = vpop.f32.mrb[46].mxu1 }
 0x279   :  { %v1159_v9 = vadd.f32 %v1721_v8, %v2185_v31  ;;  %v1153_v10 = vpop.f32.mrb[47].mxu1 }
 0x27a   :  { %v1154_v11 = vadd.f32 %v2185_v31, %v1153_v10 }
 0x27b   :  { %1266 = vst.msk [vmem:[#allocation11 + $0x1a8] sm:$0xff] %vm1212_vm4, %v1159_v9 }
 0x27c   :  { %1265 = vst.msk [vmem:[#allocation11 + $0x1a0] sm:$0xff] %vm1212_vm4, %v1154_v11  ;;  %v1724_v12 = vpop.f32.mrb[48].mxu1 }
 0x27d   :  { %v1169_v13 = vadd.f32 %v1724_v12, %v2185_v31  ;;  %v1163_v14 = vpop.f32.mrb[49].mxu1 }
 0x27e   :  { %v1164_v15 = vadd.f32 %v2185_v31, %v1163_v14 }
 0x27f   :  { %1268 = vst.msk [vmem:[#allocation11 + $0x1b8] sm:$0xff] %vm1212_vm4, %v1169_v13 }
 0x280   :  { %1267 = vst.msk [vmem:[#allocation11 + $0x1b0] sm:$0xff] %vm1212_vm4, %v1164_v15  ;;  %v1727_v16 = vpop.f32.mrb[50].mxu1 }
 0x281   :  { %v1179_v17 = vadd.f32 %v1727_v16, %v2185_v31  ;;  %v1173_v18 = vpop.f32.mrb[51].mxu1 }
 0x282   :  { %v1174_v19 = vadd.f32 %v2185_v31, %v1173_v18 }
 0x283   :  { %1270 = vst.msk [vmem:[#allocation11 + $0x1c8] sm:$0xff] %vm1212_vm4, %v1179_v17 }
 0x284   :  { %1269 = vst.msk [vmem:[#allocation11 + $0x1c0] sm:$0xff] %vm1212_vm4, %v1174_v19  ;;  %v1730_v20 = vpop.f32.mrb[52].mxu1 }
 0x285   :  { %v1189_v21 = vadd.f32 %v1730_v20, %v2185_v31  ;;  %v1183_v22 = vpop.f32.mrb[53].mxu1 }
 0x286   :  { %v1184_v23 = vadd.f32 %v2185_v31, %v1183_v22 }
 0x287   :  { %1272 = vst.msk [vmem:[#allocation11 + $0x1d8] sm:$0xff] %vm1212_vm4, %v1189_v21 }
 0x288   :  { %1271 = vst.msk [vmem:[#allocation11 + $0x1d0] sm:$0xff] %vm1212_vm4, %v1184_v23  ;;  %v1733_v24 = vpop.f32.mrb[54].mxu1 }
 0x289   :  { %v1199_v25 = vadd.f32 %v1733_v24, %v2185_v31  ;;  %v1193_v26 = vpop.f32.mrb[55].mxu1 }
 0x28a   :  { %v1194_v28 = vadd.f32 %v2185_v31, %v1193_v26 }
 0x28b   :  { %1274 = vst.msk [vmem:[#allocation11 + $0x1e8] sm:$0xff] %vm1212_vm4, %v1199_v25 }
 0x28c   :  { %1273 = vst.msk [vmem:[#allocation11 + $0x1e0] sm:$0xff] %vm1212_vm4, %v1194_v28  ;;  %v1736_v29 = vpop.f32.mrb[56].mxu1 }
 0x28d   :  { %v1209_v30 = vadd.f32 %v1736_v29, %v2185_v31  ;;  %v1203_v32 = vpop.f32.mrb[57].mxu1 }
 0x28e   :  { %v1204_v33 = vadd.f32 %v2185_v31, %v1203_v32 }
 0x28f   :  { %1276 = vst.msk [vmem:[#allocation11 + $0x1f8] sm:$0xff] %vm1212_vm4, %v1209_v30 }
 0x290   :  { %1275 = vst.msk [vmem:[#allocation11 + $0x1f0] sm:$0xff] %vm1212_vm4, %v1204_v33 }
 0x291   :  { %1921 = shalt.err (!%p1918_p2)
}
 0x292   :  { %s1922_s9 = scalar_lea.hbm %s2335_s5, 8192 }
 0x293   :  { %p1923_p3 = scmp.ne.s32.totalorder %s2335_s5, %s1922_s9  ;;  %p1926_p4 = scmp.lt.u32.totalorder %s1922_s9, %s2335_s5 }
 0x295   :  { %p1928_p5 = pnand %p1926_p4, %p1923_p3 }
 0x297   :  { %1931 = shalt.err (!%p1928_p5)
}
 0x298   :  { %1288 = dma.vmem_to_hbm [thread:$0]  %s1283_s3, 8192, %s2335_s5, [#allocation4], %s1942_s30, %s1942_s30, %s1943_s6  }
 0x299   :  { %1938 = dma.done.wait [#allocation4], 8192  }
 0x29a   :  { %1939 = vsyncadd [#allocation4], 4294959104 }
 0x29b   :  { %1292 = vsyncpa [#allocation3], 1 }
 0x29c   :  { %1293 = vsyncpa [#allocation6], 1 }
 0x29d   :  { %1294 = vsyncpa [#allocation9], 1 }
 0x29e   :  { %1295 = vsyncpa [#allocation4], 1 }

</bundles_post_ra>
